<compile_context>
chip_gen: v7x
topology: tpu7x:2x2x1
jax: 0.10.0
libtpu: 0.0.40
codegen_flags: <defaults>
</compile_context>

<pallas_src>
import functools
import math

import jax
import jax.numpy as jnp
from jax.experimental import pallas as pl
from jax.experimental.pallas import tpu as pltpu

HIDDEN = 32
NUM_LAYERS = 3
INPUT_SIZE = 300  # matrix_size[1] in the reference module


# ---------------------------------------------------------------------------
# Fused Pallas kernel: whole model forward in one call, everything in VMEM.
# ---------------------------------------------------------------------------
def _fused_rnn_kernel(x_ref, wih0_ref, b0_ref, wih1_ref, b1_ref, wih2_ref, b2_ref,
                      whh_ref, fcw_ref, fcb_ref, out_ref, proj_scratch, seq_scratch,
                      *, seq_len, batch_padded):
    """x_ref: (S*Bp, 300) bf16, time-major (row = t*Bp + b).  out_ref: (Bp, 1) f32.

    proj_scratch: (S*Bp, 2H) f32 -- fused input projection in CHAIN order
                  (row block t holds fwd proj for time t and bwd proj for time S-1-t).
    seq_scratch : (S*Bp, 2H) f32 -- current layer's bidirectional output in NATURAL
                  time order (fwd cols [0:H), bwd cols [H:2H)), reused across layers.
    """
    S, Bp, H = seq_len, batch_padded, HIDDEN
    wih_refs = (wih0_ref, wih1_ref, wih2_ref)
    b_refs = (b0_ref, b1_ref, b2_ref)

    for layer in range(NUM_LAYERS):
        # ---- hoisted input projection for BOTH directions (off the serial chain) ---
        # Full load of the previous layer's output BEFORE any store of this layer
        # (do not move this load into the time loop).
        if layer == 0:
            layer_in = x_ref[...]                                    # (S*Bp, 300) bf16
        else:
            layer_in = seq_scratch[...].astype(jnp.bfloat16)         # (S*Bp, 2H)
        proj = (
            jnp.dot(layer_in, wih_refs[layer][...],
                    preferred_element_type=jnp.float32)
            + b_refs[layer][...]
        )                                                            # (S*Bp, 2H) f32

        # Stage into chain order: at row block t, cols [0:H) = fwd proj for time t,
        # cols [H:2H) = bwd proj for time S-1-t, so the recurrence reads ONE aligned
        # (Bp, 2H) slab per step.  All static-index stores, off the critical path.
        proj_scratch[:, 0:H] = proj[:, 0:H]
        for t in range(S):
            tb = S - 1 - t
            proj_scratch[t * Bp:(t + 1) * Bp, H:2 * H] = proj[tb * Bp:(tb + 1) * Bp, H:2 * H]

        # ---- fused bidirectional recurrence -----------------------------------
        # One (Bp,2H) @ (2H,2H) bf16 MXU matmul + one f32 tanh per step; the
        # block-diagonal W_hh keeps the two directions independent.
        whh_bd = whh_ref[layer]                                      # (2H, 2H) bf16
        h = jnp.zeros((Bp, 2 * H), jnp.float32)                      # state=None -> zeros
        for t in range(S):                                           # fully unrolled (S=8)
            h = jnp.tanh(
                proj_scratch[t * Bp:(t + 1) * Bp, :]
                + jnp.dot(h.astype(jnp.bfloat16), whh_bd,
                          preferred_element_type=jnp.float32)
            )
            # De-fuse back to natural time order.  These stores are NOT on the serial
            # dependency chain (h lives in registers); only next layer's projection
            # reads them.
            seq_scratch[t * Bp:(t + 1) * Bp, 0:H] = h[:, 0:H]
            seq_scratch[(S - 1 - t) * Bp:(S - t) * Bp, H:2 * H] = h[:, H:2 * H]

    # ---- fused final Linear(2H -> 1) on the last timestep of the last layer ----
    # VPU multiply + lane reduction instead of an N=1 MXU matmul.
    last = seq_scratch[(S - 1) * Bp:S * Bp, :]                       # == rnn_outputs[:, -1, :]
    out_ref[...] = (
        jnp.sum(last * fcw_ref[...], axis=-1, keepdims=True) + fcb_ref[...]
    )


# ---------------------------------------------------------------------------
# Kernel-side packing (bf16 MXU operands, block-diagonal W_hh, fc row vector).
# ---------------------------------------------------------------------------
def _pack_for_kernel(packed):
    wih0, b0, wih1, b1, wih2, b2, whh, fc_w, fc_b = packed
    H = HIDDEN
    blocks = []
    for layer in range(NUM_LAYERS):
        z = jnp.zeros((H, H), jnp.float32)
        top = jnp.concatenate([whh[2 * layer], z], axis=1)
        bot = jnp.concatenate([z, whh[2 * layer + 1]], axis=1)
        blocks.append(jnp.concatenate([top, bot], axis=0))           # (2H, 2H) block-diag
    whh_bd = jnp.stack(blocks, axis=0).astype(jnp.bfloat16)          # (3, 2H, 2H)
    return (wih0.astype(jnp.bfloat16), b0,
            wih1.astype(jnp.bfloat16), b1,
            wih2.astype(jnp.bfloat16), b2,
            whh_bd,
            fc_w.reshape(1, 2 * H).astype(jnp.float32),              # row vector for VPU fc
            fc_b.astype(jnp.float32))


# ---------------------------------------------------------------------------
# Wrapper
# ---------------------------------------------------------------------------
def rnn_model_forward(X, packed):
    """X: (B, S, 300) batch_first, like the PyTorch module. Returns (B, 1) float32."""
    wih0, b0, wih1, b1, wih2, b2, whh_bd, fc_w_row, fc_b = _pack_for_kernel(packed)
    B, S, F = X.shape
    Bp = -(-B // 8) * 8                     # pad batch to a full sublane tile (8 rows)
    Xp = jnp.zeros((Bp, S, F), jnp.float32).at[:B, :, :].set(X.astype(jnp.float32))
    # time-major, flattened rows: row index = t*Bp + b ; bf16 MXU operand
    x_flat = jnp.transpose(Xp, (1, 0, 2)).reshape(S * Bp, F).astype(jnp.bfloat16)

    kernel = functools.partial(_fused_rnn_kernel, seq_len=S, batch_padded=Bp)
    vmem = pl.BlockSpec(memory_space=pltpu.MemorySpace.VMEM)
    out = pl.pallas_call(
        kernel,
        out_shape=jax.ShapeDtypeStruct((Bp, 1), jnp.float32),
        in_specs=[vmem] * 10,
        out_specs=vmem,
        scratch_shapes=[pltpu.VMEM((S * Bp, 2 * HIDDEN), jnp.float32),   # proj (chain order)
                        pltpu.VMEM((S * Bp, 2 * HIDDEN), jnp.float32)],  # layer out (natural)
    )(x_flat, wih0, b0, wih1, b1, wih2, b2, whh_bd, fc_w_row, fc_b)
    return out[:B]


# ---------------------------------------------------------------------------
# Parameter init (deterministic, PyTorch-style uniform(-1/sqrt(H), 1/sqrt(H)))
# Weights are stored in "x @ W" layout (i.e. already transposed relative to
# PyTorch's weight_ih_l*/weight_hh_l*; weights ported from a real PyTorch
# checkpoint must be transposed before packing):
#   wih_l : (in_dim, 2H)   cols [0:H) = forward dir, [H:2H) = backward dir
#   b_l   : (1, 2H)        b_ih + b_hh, both directions
#   whh   : (6, H, H)      order [l0_f, l0_b, l1_f, l1_b, l2_f, l2_b]
# ---------------------------------------------------------------------------
def init_params(key):
    k_rnn = 1.0 / math.sqrt(HIDDEN)
    wihs, bs, whhs = [], [], []
    for layer in range(NUM_LAYERS):
        in_dim = INPUT_SIZE if layer == 0 else 2 * HIDDEN
        wih_dirs, b_dirs = [], []
        for _direction in range(2):  # 0 = forward, 1 = backward
            key, k1, k2, k3, k4 = jax.random.split(key, 5)
            w_ih = jax.random.uniform(k1, (in_dim, HIDDEN), jnp.float32, -k_rnn, k_rnn)
            w_hh = jax.random.uniform(k2, (HIDDEN, HIDDEN), jnp.float32, -k_rnn, k_rnn)
            b_ih = jax.random.uniform(k3, (HIDDEN,), jnp.float32, -k_rnn, k_rnn)
            b_hh = jax.random.uniform(k4, (HIDDEN,), jnp.float32, -k_rnn, k_rnn)
            wih_dirs.append(w_ih)
            b_dirs.append((b_ih + b_hh).reshape(1, HIDDEN))
            whhs.append(w_hh)
        wihs.append(jnp.concatenate(wih_dirs, axis=1))   # (in_dim, 2H)
        bs.append(jnp.concatenate(b_dirs, axis=1))       # (1, 2H)
    whh = jnp.stack(whhs, axis=0)                        # (6, H, H)

    k_fc = 1.0 / math.sqrt(2 * HIDDEN)
    key, kw, kb = jax.random.split(key, 3)
    fc_w = jax.random.uniform(kw, (2 * HIDDEN, 1), jnp.float32, -k_fc, k_fc)
    fc_b = jax.random.uniform(kb, (1, 1), jnp.float32, -k_fc, k_fc)
    return (wihs[0], bs[0], wihs[1], bs[1], wihs[2], bs[2], whh, fc_w, fc_b)


# ---------------------------------------------------------------------------
# Pure-JAX f32 reference (same math as the PyTorch module) for a sanity check
# ---------------------------------------------------------------------------
def rnn_model_reference(X, packed):
    wih0, b0, wih1, b1, wih2, b2, whh, fc_w, fc_b = packed
    B, S, _ = X.shape
    hp = jax.lax.Precision.HIGHEST
    x = jnp.transpose(X, (1, 0, 2)).astype(jnp.float32)  # (S, B, F)
    wihs, bs = (wih0, wih1, wih2), (b0, b1, b2)
    for layer in range(NUM_LAYERS):
        outs = []
        for d in range(2):
            wih_d = wihs[layer][:, d * HIDDEN:(d + 1) * HIDDEN]
            b_d = bs[layer][:, d * HIDDEN:(d + 1) * HIDDEN]
            whh_d = whh[2 * layer + d]
            xs = x[::-1] if d == 1 else x
            h = jnp.zeros((B, HIDDEN), jnp.float32)
            hs = []
            for t in range(S):
                h = jnp.tanh(jnp.dot(xs[t], wih_d, precision=hp)
                             + jnp.dot(h, whh_d, precision=hp) + b_d)
                hs.append(h)
            o = jnp.stack(hs, axis=0)
            if d == 1:
                o = o[::-1]
            outs.append(o)
        x = jnp.concatenate(outs, axis=-1)
    last = x[-1]                                          # (B, 2H)
    return jnp.dot(last, fc_w, precision=hp) + fc_b


if __name__ == "__main__":
    key = jax.random.PRNGKey(0)
    key, k_in = jax.random.split(key)

    batch, seq = 2, 8
    X = jax.random.normal(k_in, (batch, seq, INPUT_SIZE), dtype=jnp.float32)

    packed = init_params(key)

    fwd = jax.jit(rnn_model_forward)
    out = jax.block_until_ready(fwd(X, packed))
    assert out.shape == (batch, 1), out.shape

    # bf16 MXU operands vs f32/HIGHEST reference: expected error is a few 1e-3,
    # well inside the tolerance below.
    ref = rnn_model_reference(X, packed)
    assert jnp.allclose(out, ref, atol=2e-2, rtol=2e-2), (out, ref)

    print("KERNEL_OK")
</pallas_src>

<mosaic_0001>
module attributes {stable_mosaic.version = 11 : i64} {
  func.func @_fused_rnn_kernel(%arg0: memref<64x300xbf16, #tpu.memory_space<vmem>>, %arg1: memref<300x64xbf16, #tpu.memory_space<vmem>>, %arg2: memref<1x64xf32, #tpu.memory_space<vmem>>, %arg3: memref<64x64xbf16, #tpu.memory_space<vmem>>, %arg4: memref<1x64xf32, #tpu.memory_space<vmem>>, %arg5: memref<64x64xbf16, #tpu.memory_space<vmem>>, %arg6: memref<1x64xf32, #tpu.memory_space<vmem>>, %arg7: memref<3x64x64xbf16, #tpu.memory_space<vmem>>, %arg8: memref<1x64xf32, #tpu.memory_space<vmem>>, %arg9: memref<1x1xf32, #tpu.memory_space<vmem>>, %arg10: memref<8x1xf32, #tpu.memory_space<vmem>>, %arg11: memref<64x64xf32, #tpu.memory_space<vmem>>, %arg12: memref<64x64xf32, #tpu.memory_space<vmem>>) attributes {dimension_semantics = [], scalar_prefetch = 0 : i64, scratch_operands = 2 : i64, tpu.core_type = #tpu.core_type<tc>} {
    %c0 = arith.constant 0 : index
    %c0_0 = arith.constant 0 : index
    %0 = vector.load %arg0[%c0, %c0_0] : memref<64x300xbf16, #tpu.memory_space<vmem>>, vector<64x300xbf16>
    %c0_1 = arith.constant 0 : index
    %c0_2 = arith.constant 0 : index
    %1 = vector.load %arg1[%c0_1, %c0_2] : memref<300x64xbf16, #tpu.memory_space<vmem>>, vector<300x64xbf16>
    %cst = arith.constant dense<0.000000e+00> : vector<64x64xf32>
    %2 = tpu.matmul %0, %1, %cst {dimension_numbers = #tpu.dot_dimension_numbers<[1], [0], [0], [1], [0, 0, 1, 1], [], []>} : vector<64x300xbf16>, vector<300x64xbf16>, vector<64x64xf32> -> vector<64x64xf32>
    %c0_3 = arith.constant 0 : index
    %c0_4 = arith.constant 0 : index
    %3 = vector.load %arg2[%c0_3, %c0_4] : memref<1x64xf32, #tpu.memory_space<vmem>>, vector<1x64xf32>
    %4 = vector.broadcast %3 : vector<1x64xf32> to vector<64x64xf32>
    %5 = arith.addf %2, %4 : vector<64x64xf32>
    %6 = vector.extract_strided_slice %5 {offsets = [0, 0], sizes = [64, 32], strides = [1, 1]} : vector<64x64xf32> to vector<64x32xf32>
    %c0_5 = arith.constant 0 : index
    %c0_6 = arith.constant 0 : index
    %7 = vector.load %arg11[%c0_5, %c0_6] : memref<64x64xf32, #tpu.memory_space<vmem>>, vector<64x32xf32>
    tpu.vector_store %arg11[%c0_5, %c0_6], %6 {strides = array<i32>} : memref<64x64xf32, #tpu.memory_space<vmem>>, vector<64x32xf32>,
    %8 = vector.extract_strided_slice %5 {offsets = [56, 32], sizes = [8, 32], strides = [1, 1]} : vector<64x64xf32> to vector<8x32xf32>
    %c0_7 = arith.constant 0 : index
    %c32 = arith.constant 32 : index
    %9 = vector.load %arg11[%c0_7, %c32] : memref<64x64xf32, #tpu.memory_space<vmem>>, vector<8x32xf32>
    tpu.vector_store %arg11[%c0_7, %c32], %8 {strides = array<i32>} : memref<64x64xf32, #tpu.memory_space<vmem>>, vector<8x32xf32>,
    %10 = vector.extract_strided_slice %5 {offsets = [48, 32], sizes = [8, 32], strides = [1, 1]} : vector<64x64xf32> to vector<8x32xf32>
    %c8 = arith.constant 8 : index
    %c32_8 = arith.constant 32 : index
    %11 = vector.load %arg11[%c8, %c32_8] : memref<64x64xf32, #tpu.memory_space<vmem>>, vector<8x32xf32>
    tpu.vector_store %arg11[%c8, %c32_8], %10 {strides = array<i32>} : memref<64x64xf32, #tpu.memory_space<vmem>>, vector<8x32xf32>,
    %12 = vector.extract_strided_slice %5 {offsets = [40, 32], sizes = [8, 32], strides = [1, 1]} : vector<64x64xf32> to vector<8x32xf32>
    %c16 = arith.constant 16 : index
    %c32_9 = arith.constant 32 : index
    %13 = vector.load %arg11[%c16, %c32_9] : memref<64x64xf32, #tpu.memory_space<vmem>>, vector<8x32xf32>
    tpu.vector_store %arg11[%c16, %c32_9], %12 {strides = array<i32>} : memref<64x64xf32, #tpu.memory_space<vmem>>, vector<8x32xf32>,
    %14 = vector.extract_strided_slice %5 {offsets = [32, 32], sizes = [8, 32], strides = [1, 1]} : vector<64x64xf32> to vector<8x32xf32>
    %c24 = arith.constant 24 : index
    %c32_10 = arith.constant 32 : index
    %15 = vector.load %arg11[%c24, %c32_10] : memref<64x64xf32, #tpu.memory_space<vmem>>, vector<8x32xf32>
    tpu.vector_store %arg11[%c24, %c32_10], %14 {strides = array<i32>} : memref<64x64xf32, #tpu.memory_space<vmem>>, vector<8x32xf32>,
    %16 = vector.extract_strided_slice %5 {offsets = [24, 32], sizes = [8, 32], strides = [1, 1]} : vector<64x64xf32> to vector<8x32xf32>
    %c32_11 = arith.constant 32 : index
    %c32_12 = arith.constant 32 : index
    %17 = vector.load %arg11[%c32_11, %c32_12] : memref<64x64xf32, #tpu.memory_space<vmem>>, vector<8x32xf32>
    tpu.vector_store %arg11[%c32_11, %c32_12], %16 {strides = array<i32>} : memref<64x64xf32, #tpu.memory_space<vmem>>, vector<8x32xf32>,
    %18 = vector.extract_strided_slice %5 {offsets = [16, 32], sizes = [8, 32], strides = [1, 1]} : vector<64x64xf32> to vector<8x32xf32>
    %c40 = arith.constant 40 : index
    %c32_13 = arith.constant 32 : index
    %19 = vector.load %arg11[%c40, %c32_13] : memref<64x64xf32, #tpu.memory_space<vmem>>, vector<8x32xf32>
    tpu.vector_store %arg11[%c40, %c32_13], %18 {strides = array<i32>} : memref<64x64xf32, #tpu.memory_space<vmem>>, vector<8x32xf32>,
    %20 = vector.extract_strided_slice %5 {offsets = [8, 32], sizes = [8, 32], strides = [1, 1]} : vector<64x64xf32> to vector<8x32xf32>
    %c48 = arith.constant 48 : index
    %c32_14 = arith.constant 32 : index
    %21 = vector.load %arg11[%c48, %c32_14] : memref<64x64xf32, #tpu.memory_space<vmem>>, vector<8x32xf32>
    tpu.vector_store %arg11[%c48, %c32_14], %20 {strides = array<i32>} : memref<64x64xf32, #tpu.memory_space<vmem>>, vector<8x32xf32>,
    %22 = vector.extract_strided_slice %5 {offsets = [0, 32], sizes = [8, 32], strides = [1, 1]} : vector<64x64xf32> to vector<8x32xf32>
    %c56 = arith.constant 56 : index
    %c32_15 = arith.constant 32 : index
    %23 = vector.load %arg11[%c56, %c32_15] : memref<64x64xf32, #tpu.memory_space<vmem>>, vector<8x32xf32>
    tpu.vector_store %arg11[%c56, %c32_15], %22 {strides = array<i32>} : memref<64x64xf32, #tpu.memory_space<vmem>>, vector<8x32xf32>,
    %c0_16 = arith.constant 0 : index
    %c0_17 = arith.constant 0 : index
    %c0_18 = arith.constant 0 : index
    %24 = vector.load %arg7[%c0_16, %c0_17, %c0_18] : memref<3x64x64xbf16, #tpu.memory_space<vmem>>, vector<1x64x64xbf16>
    %25 = vector.shape_cast %24 : vector<1x64x64xbf16> to vector<64x64xbf16>
    %cst_19 = arith.constant 0.000000e+00 : f32
    %26 = vector.broadcast %cst_19 : f32 to vector<8x64xf32>
    %c0_20 = arith.constant 0 : index
    %c0_21 = arith.constant 0 : index
    %27 = vector.load %arg11[%c0_20, %c0_21] : memref<64x64xf32, #tpu.memory_space<vmem>>, vector<8x64xf32>
    %28 = arith.truncf %26 : vector<8x64xf32> to vector<8x64xbf16>
    %cst_22 = arith.constant dense<0.000000e+00> : vector<8x64xf32>
    %29 = tpu.matmul %28, %25, %cst_22 {dimension_numbers = #tpu.dot_dimension_numbers<[1], [0], [0], [1], [0, 0, 1, 1], [], []>} : vector<8x64xbf16>, vector<64x64xbf16>, vector<8x64xf32> -> vector<8x64xf32>
    %30 = arith.addf %27, %29 : vector<8x64xf32>
    %31 = math.tanh %30 : vector<8x64xf32>
    %32 = vector.extract_strided_slice %31 {offsets = [0, 0], sizes = [8, 32], strides = [1, 1]} : vector<8x64xf32> to vector<8x32xf32>
    %c0_23 = arith.constant 0 : index
    %c0_24 = arith.constant 0 : index
    %33 = vector.load %arg12[%c0_23, %c0_24] : memref<64x64xf32, #tpu.memory_space<vmem>>, vector<8x32xf32>
    tpu.vector_store %arg12[%c0_23, %c0_24], %32 {strides = array<i32>} : memref<64x64xf32, #tpu.memory_space<vmem>>, vector<8x32xf32>,
    %34 = vector.extract_strided_slice %31 {offsets = [0, 32], sizes = [8, 32], strides = [1, 1]} : vector<8x64xf32> to vector<8x32xf32>
    %c56_25 = arith.constant 56 : index
    %c32_26 = arith.constant 32 : index
    %35 = vector.load %arg12[%c56_25, %c32_26] : memref<64x64xf32, #tpu.memory_space<vmem>>, vector<8x32xf32>
    tpu.vector_store %arg12[%c56_25, %c32_26], %34 {strides = array<i32>} : memref<64x64xf32, #tpu.memory_space<vmem>>, vector<8x32xf32>,
    %c8_27 = arith.constant 8 : index
    %c0_28 = arith.constant 0 : index
    %36 = vector.load %arg11[%c8_27, %c0_28] : memref<64x64xf32, #tpu.memory_space<vmem>>, vector<8x64xf32>
    %37 = arith.truncf %31 : vector<8x64xf32> to vector<8x64xbf16>
    %cst_29 = arith.constant dense<0.000000e+00> : vector<8x64xf32>
    %38 = tpu.matmul %37, %25, %cst_29 {dimension_numbers = #tpu.dot_dimension_numbers<[1], [0], [0], [1], [0, 0, 1, 1], [], []>} : vector<8x64xbf16>, vector<64x64xbf16>, vector<8x64xf32> -> vector<8x64xf32>
    %39 = arith.addf %36, %38 : vector<8x64xf32>
    %40 = math.tanh %39 : vector<8x64xf32>
    %41 = vector.extract_strided_slice %40 {offsets = [0, 0], sizes = [8, 32], strides = [1, 1]} : vector<8x64xf32> to vector<8x32xf32>
    %c8_30 = arith.constant 8 : index
    %c0_31 = arith.constant 0 : index
    %42 = vector.load %arg12[%c8_30, %c0_31] : memref<64x64xf32, #tpu.memory_space<vmem>>, vector<8x32xf32>
    tpu.vector_store %arg12[%c8_30, %c0_31], %41 {strides = array<i32>} : memref<64x64xf32, #tpu.memory_space<vmem>>, vector<8x32xf32>,
    %43 = vector.extract_strided_slice %40 {offsets = [0, 32], sizes = [8, 32], strides = [1, 1]} : vector<8x64xf32> to vector<8x32xf32>
    %c48_32 = arith.constant 48 : index
    %c32_33 = arith.constant 32 : index
    %44 = vector.load %arg12[%c48_32, %c32_33] : memref<64x64xf32, #tpu.memory_space<vmem>>, vector<8x32xf32>
    tpu.vector_store %arg12[%c48_32, %c32_33], %43 {strides = array<i32>} : memref<64x64xf32, #tpu.memory_space<vmem>>, vector<8x32xf32>,
    %c16_34 = arith.constant 16 : index
    %c0_35 = arith.constant 0 : index
    %45 = vector.load %arg11[%c16_34, %c0_35] : memref<64x64xf32, #tpu.memory_space<vmem>>, vector<8x64xf32>
    %46 = arith.truncf %40 : vector<8x64xf32> to vector<8x64xbf16>
    %cst_36 = arith.constant dense<0.000000e+00> : vector<8x64xf32>
    %47 = tpu.matmul %46, %25, %cst_36 {dimension_numbers = #tpu.dot_dimension_numbers<[1], [0], [0], [1], [0, 0, 1, 1], [], []>} : vector<8x64xbf16>, vector<64x64xbf16>, vector<8x64xf32> -> vector<8x64xf32>
    %48 = arith.addf %45, %47 : vector<8x64xf32>
    %49 = math.tanh %48 : vector<8x64xf32>
    %50 = vector.extract_strided_slice %49 {offsets = [0, 0], sizes = [8, 32], strides = [1, 1]} : vector<8x64xf32> to vector<8x32xf32>
    %c16_37 = arith.constant 16 : index
    %c0_38 = arith.constant 0 : index
    %51 = vector.load %arg12[%c16_37, %c0_38] : memref<64x64xf32, #tpu.memory_space<vmem>>, vector<8x32xf32>
    tpu.vector_store %arg12[%c16_37, %c0_38], %50 {strides = array<i32>} : memref<64x64xf32, #tpu.memory_space<vmem>>, vector<8x32xf32>,
    %52 = vector.extract_strided_slice %49 {offsets = [0, 32], sizes = [8, 32], strides = [1, 1]} : vector<8x64xf32> to vector<8x32xf32>
    %c40_39 = arith.constant 40 : index
    %c32_40 = arith.constant 32 : index
    %53 = vector.load %arg12[%c40_39, %c32_40] : memref<64x64xf32, #tpu.memory_space<vmem>>, vector<8x32xf32>
    tpu.vector_store %arg12[%c40_39, %c32_40], %52 {strides = array<i32>} : memref<64x64xf32, #tpu.memory_space<vmem>>, vector<8x32xf32>,
    %c24_41 = arith.constant 24 : index
    %c0_42 = arith.constant 0 : index
    %54 = vector.load %arg11[%c24_41, %c0_42] : memref<64x64xf32, #tpu.memory_space<vmem>>, vector<8x64xf32>
    %55 = arith.truncf %49 : vector<8x64xf32> to vector<8x64xbf16>
    %cst_43 = arith.constant dense<0.000000e+00> : vector<8x64xf32>
    %56 = tpu.matmul %55, %25, %cst_43 {dimension_numbers = #tpu.dot_dimension_numbers<[1], [0], [0], [1], [0, 0, 1, 1], [], []>} : vector<8x64xbf16>, vector<64x64xbf16>, vector<8x64xf32> -> vector<8x64xf32>
    %57 = arith.addf %54, %56 : vector<8x64xf32>
    %58 = math.tanh %57 : vector<8x64xf32>
    %59 = vector.extract_strided_slice %58 {offsets = [0, 0], sizes = [8, 32], strides = [1, 1]} : vector<8x64xf32> to vector<8x32xf32>
    %c24_44 = arith.constant 24 : index
    %c0_45 = arith.constant 0 : index
    %60 = vector.load %arg12[%c24_44, %c0_45] : memref<64x64xf32, #tpu.memory_space<vmem>>, vector<8x32xf32>
    tpu.vector_store %arg12[%c24_44, %c0_45], %59 {strides = array<i32>} : memref<64x64xf32, #tpu.memory_space<vmem>>, vector<8x32xf32>,
    %61 = vector.extract_strided_slice %58 {offsets = [0, 32], sizes = [8, 32], strides = [1, 1]} : vector<8x64xf32> to vector<8x32xf32>
    %c32_46 = arith.constant 32 : index
    %c32_47 = arith.constant 32 : index
    %62 = vector.load %arg12[%c32_46, %c32_47] : memref<64x64xf32, #tpu.memory_space<vmem>>, vector<8x32xf32>
    tpu.vector_store %arg12[%c32_46, %c32_47], %61 {strides = array<i32>} : memref<64x64xf32, #tpu.memory_space<vmem>>, vector<8x32xf32>,
    %c32_48 = arith.constant 32 : index
    %c0_49 = arith.constant 0 : index
    %63 = vector.load %arg11[%c32_48, %c0_49] : memref<64x64xf32, #tpu.memory_space<vmem>>, vector<8x64xf32>
    %64 = arith.truncf %58 : vector<8x64xf32> to vector<8x64xbf16>
    %cst_50 = arith.constant dense<0.000000e+00> : vector<8x64xf32>
    %65 = tpu.matmul %64, %25, %cst_50 {dimension_numbers = #tpu.dot_dimension_numbers<[1], [0], [0], [1], [0, 0, 1, 1], [], []>} : vector<8x64xbf16>, vector<64x64xbf16>, vector<8x64xf32> -> vector<8x64xf32>
    %66 = arith.addf %63, %65 : vector<8x64xf32>
    %67 = math.tanh %66 : vector<8x64xf32>
    %68 = vector.extract_strided_slice %67 {offsets = [0, 0], sizes = [8, 32], strides = [1, 1]} : vector<8x64xf32> to vector<8x32xf32>
    %c32_51 = arith.constant 32 : index
    %c0_52 = arith.constant 0 : index
    %69 = vector.load %arg12[%c32_51, %c0_52] : memref<64x64xf32, #tpu.memory_space<vmem>>, vector<8x32xf32>
    tpu.vector_store %arg12[%c32_51, %c0_52], %68 {strides = array<i32>} : memref<64x64xf32, #tpu.memory_space<vmem>>, vector<8x32xf32>,
    %70 = vector.extract_strided_slice %67 {offsets = [0, 32], sizes = [8, 32], strides = [1, 1]} : vector<8x64xf32> to vector<8x32xf32>
    %c24_53 = arith.constant 24 : index
    %c32_54 = arith.constant 32 : index
    %71 = vector.load %arg12[%c24_53, %c32_54] : memref<64x64xf32, #tpu.memory_space<vmem>>, vector<8x32xf32>
    tpu.vector_store %arg12[%c24_53, %c32_54], %70 {strides = array<i32>} : memref<64x64xf32, #tpu.memory_space<vmem>>, vector<8x32xf32>,
    %c40_55 = arith.constant 40 : index
    %c0_56 = arith.constant 0 : index
    %72 = vector.load %arg11[%c40_55, %c0_56] : memref<64x64xf32, #tpu.memory_space<vmem>>, vector<8x64xf32>
    %73 = arith.truncf %67 : vector<8x64xf32> to vector<8x64xbf16>
    %cst_57 = arith.constant dense<0.000000e+00> : vector<8x64xf32>
    %74 = tpu.matmul %73, %25, %cst_57 {dimension_numbers = #tpu.dot_dimension_numbers<[1], [0], [0], [1], [0, 0, 1, 1], [], []>} : vector<8x64xbf16>, vector<64x64xbf16>, vector<8x64xf32> -> vector<8x64xf32>
    %75 = arith.addf %72, %74 : vector<8x64xf32>
    %76 = math.tanh %75 : vector<8x64xf32>
    %77 = vector.extract_strided_slice %76 {offsets = [0, 0], sizes = [8, 32], strides = [1, 1]} : vector<8x64xf32> to vector<8x32xf32>
    %c40_58 = arith.constant 40 : index
    %c0_59 = arith.constant 0 : index
    %78 = vector.load %arg12[%c40_58, %c0_59] : memref<64x64xf32, #tpu.memory_space<vmem>>, vector<8x32xf32>
    tpu.vector_store %arg12[%c40_58, %c0_59], %77 {strides = array<i32>} : memref<64x64xf32, #tpu.memory_space<vmem>>, vector<8x32xf32>,
    %79 = vector.extract_strided_slice %76 {offsets = [0, 32], sizes = [8, 32], strides = [1, 1]} : vector<8x64xf32> to vector<8x32xf32>
    %c16_60 = arith.constant 16 : index
    %c32_61 = arith.constant 32 : index
    %80 = vector.load %arg12[%c16_60, %c32_61] : memref<64x64xf32, #tpu.memory_space<vmem>>, vector<8x32xf32>
    tpu.vector_store %arg12[%c16_60, %c32_61], %79 {strides = array<i32>} : memref<64x64xf32, #tpu.memory_space<vmem>>, vector<8x32xf32>,
    %c48_62 = arith.constant 48 : index
    %c0_63 = arith.constant 0 : index
    %81 = vector.load %arg11[%c48_62, %c0_63] : memref<64x64xf32, #tpu.memory_space<vmem>>, vector<8x64xf32>
    %82 = arith.truncf %76 : vector<8x64xf32> to vector<8x64xbf16>
    %cst_64 = arith.constant dense<0.000000e+00> : vector<8x64xf32>
    %83 = tpu.matmul %82, %25, %cst_64 {dimension_numbers = #tpu.dot_dimension_numbers<[1], [0], [0], [1], [0, 0, 1, 1], [], []>} : vector<8x64xbf16>, vector<64x64xbf16>, vector<8x64xf32> -> vector<8x64xf32>
    %84 = arith.addf %81, %83 : vector<8x64xf32>
    %85 = math.tanh %84 : vector<8x64xf32>
    %86 = vector.extract_strided_slice %85 {offsets = [0, 0], sizes = [8, 32], strides = [1, 1]} : vector<8x64xf32> to vector<8x32xf32>
    %c48_65 = arith.constant 48 : index
    %c0_66 = arith.constant 0 : index
    %87 = vector.load %arg12[%c48_65, %c0_66] : memref<64x64xf32, #tpu.memory_space<vmem>>, vector<8x32xf32>
    tpu.vector_store %arg12[%c48_65, %c0_66], %86 {strides = array<i32>} : memref<64x64xf32, #tpu.memory_space<vmem>>, vector<8x32xf32>,
    %88 = vector.extract_strided_slice %85 {offsets = [0, 32], sizes = [8, 32], strides = [1, 1]} : vector<8x64xf32> to vector<8x32xf32>
    %c8_67 = arith.constant 8 : index
    %c32_68 = arith.constant 32 : index
    %89 = vector.load %arg12[%c8_67, %c32_68] : memref<64x64xf32, #tpu.memory_space<vmem>>, vector<8x32xf32>
    tpu.vector_store %arg12[%c8_67, %c32_68], %88 {strides = array<i32>} : memref<64x64xf32, #tpu.memory_space<vmem>>, vector<8x32xf32>,
    %c56_69 = arith.constant 56 : index
    %c0_70 = arith.constant 0 : index
    %90 = vector.load %arg11[%c56_69, %c0_70] : memref<64x64xf32, #tpu.memory_space<vmem>>, vector<8x64xf32>
    %91 = arith.truncf %85 : vector<8x64xf32> to vector<8x64xbf16>
    %cst_71 = arith.constant dense<0.000000e+00> : vector<8x64xf32>
    %92 = tpu.matmul %91, %25, %cst_71 {dimension_numbers = #tpu.dot_dimension_numbers<[1], [0], [0], [1], [0, 0, 1, 1], [], []>} : vector<8x64xbf16>, vector<64x64xbf16>, vector<8x64xf32> -> vector<8x64xf32>
    %93 = arith.addf %90, %92 : vector<8x64xf32>
    %94 = math.tanh %93 : vector<8x64xf32>
    %95 = vector.extract_strided_slice %94 {offsets = [0, 0], sizes = [8, 32], strides = [1, 1]} : vector<8x64xf32> to vector<8x32xf32>
    %c56_72 = arith.constant 56 : index
    %c0_73 = arith.constant 0 : index
    %96 = vector.load %arg12[%c56_72, %c0_73] : memref<64x64xf32, #tpu.memory_space<vmem>>, vector<8x32xf32>
    tpu.vector_store %arg12[%c56_72, %c0_73], %95 {strides = array<i32>} : memref<64x64xf32, #tpu.memory_space<vmem>>, vector<8x32xf32>,
    %97 = vector.extract_strided_slice %94 {offsets = [0, 32], sizes = [8, 32], strides = [1, 1]} : vector<8x64xf32> to vector<8x32xf32>
    %c0_74 = arith.constant 0 : index
    %c32_75 = arith.constant 32 : index
    %98 = vector.load %arg12[%c0_74, %c32_75] : memref<64x64xf32, #tpu.memory_space<vmem>>, vector<8x32xf32>
    tpu.vector_store %arg12[%c0_74, %c32_75], %97 {strides = array<i32>} : memref<64x64xf32, #tpu.memory_space<vmem>>, vector<8x32xf32>,
    %c0_76 = arith.constant 0 : index
    %c0_77 = arith.constant 0 : index
    %99 = vector.load %arg12[%c0_76, %c0_77] : memref<64x64xf32, #tpu.memory_space<vmem>>, vector<64x64xf32>
    %100 = arith.truncf %99 : vector<64x64xf32> to vector<64x64xbf16>
    %c0_78 = arith.constant 0 : index
    %c0_79 = arith.constant 0 : index
    %101 = vector.load %arg3[%c0_78, %c0_79] : memref<64x64xbf16, #tpu.memory_space<vmem>>, vector<64x64xbf16>
    %cst_80 = arith.constant dense<0.000000e+00> : vector<64x64xf32>
    %102 = tpu.matmul %100, %101, %cst_80 {dimension_numbers = #tpu.dot_dimension_numbers<[1], [0], [0], [1], [0, 0, 1, 1], [], []>} : vector<64x64xbf16>, vector<64x64xbf16>, vector<64x64xf32> -> vector<64x64xf32>
    %c0_81 = arith.constant 0 : index
    %c0_82 = arith.constant 0 : index
    %103 = vector.load %arg4[%c0_81, %c0_82] : memref<1x64xf32, #tpu.memory_space<vmem>>, vector<1x64xf32>
    %104 = vector.broadcast %103 : vector<1x64xf32> to vector<64x64xf32>
    %105 = arith.addf %102, %104 : vector<64x64xf32>
    %106 = vector.extract_strided_slice %105 {offsets = [0, 0], sizes = [64, 32], strides = [1, 1]} : vector<64x64xf32> to vector<64x32xf32>
    %c0_83 = arith.constant 0 : index
    %c0_84 = arith.constant 0 : index
    %107 = vector.load %arg11[%c0_83, %c0_84] : memref<64x64xf32, #tpu.memory_space<vmem>>, vector<64x32xf32>
    tpu.vector_store %arg11[%c0_83, %c0_84], %106 {strides = array<i32>} : memref<64x64xf32, #tpu.memory_space<vmem>>, vector<64x32xf32>,
    %108 = vector.extract_strided_slice %105 {offsets = [56, 32], sizes = [8, 32], strides = [1, 1]} : vector<64x64xf32> to vector<8x32xf32>
    %c0_85 = arith.constant 0 : index
    %c32_86 = arith.constant 32 : index
    %109 = vector.load %arg11[%c0_85, %c32_86] : memref<64x64xf32, #tpu.memory_space<vmem>>, vector<8x32xf32>
    tpu.vector_store %arg11[%c0_85, %c32_86], %108 {strides = array<i32>} : memref<64x64xf32, #tpu.memory_space<vmem>>, vector<8x32xf32>,
    %110 = vector.extract_strided_slice %105 {offsets = [48, 32], sizes = [8, 32], strides = [1, 1]} : vector<64x64xf32> to vector<8x32xf32>
    %c8_87 = arith.constant 8 : index
    %c32_88 = arith.constant 32 : index
    %111 = vector.load %arg11[%c8_87, %c32_88] : memref<64x64xf32, #tpu.memory_space<vmem>>, vector<8x32xf32>
    tpu.vector_store %arg11[%c8_87, %c32_88], %110 {strides = array<i32>} : memref<64x64xf32, #tpu.memory_space<vmem>>, vector<8x32xf32>,
    %112 = vector.extract_strided_slice %105 {offsets = [40, 32], sizes = [8, 32], strides = [1, 1]} : vector<64x64xf32> to vector<8x32xf32>
    %c16_89 = arith.constant 16 : index
    %c32_90 = arith.constant 32 : index
    %113 = vector.load %arg11[%c16_89, %c32_90] : memref<64x64xf32, #tpu.memory_space<vmem>>, vector<8x32xf32>
    tpu.vector_store %arg11[%c16_89, %c32_90], %112 {strides = array<i32>} : memref<64x64xf32, #tpu.memory_space<vmem>>, vector<8x32xf32>,
    %114 = vector.extract_strided_slice %105 {offsets = [32, 32], sizes = [8, 32], strides = [1, 1]} : vector<64x64xf32> to vector<8x32xf32>
    %c24_91 = arith.constant 24 : index
    %c32_92 = arith.constant 32 : index
    %115 = vector.load %arg11[%c24_91, %c32_92] : memref<64x64xf32, #tpu.memory_space<vmem>>, vector<8x32xf32>
    tpu.vector_store %arg11[%c24_91, %c32_92], %114 {strides = array<i32>} : memref<64x64xf32, #tpu.memory_space<vmem>>, vector<8x32xf32>,
    %116 = vector.extract_strided_slice %105 {offsets = [24, 32], sizes = [8, 32], strides = [1, 1]} : vector<64x64xf32> to vector<8x32xf32>
    %c32_93 = arith.constant 32 : index
    %c32_94 = arith.constant 32 : index
    %117 = vector.load %arg11[%c32_93, %c32_94] : memref<64x64xf32, #tpu.memory_space<vmem>>, vector<8x32xf32>
    tpu.vector_store %arg11[%c32_93, %c32_94], %116 {strides = array<i32>} : memref<64x64xf32, #tpu.memory_space<vmem>>, vector<8x32xf32>,
    %118 = vector.extract_strided_slice %105 {offsets = [16, 32], sizes = [8, 32], strides = [1, 1]} : vector<64x64xf32> to vector<8x32xf32>
    %c40_95 = arith.constant 40 : index
    %c32_96 = arith.constant 32 : index
    %119 = vector.load %arg11[%c40_95, %c32_96] : memref<64x64xf32, #tpu.memory_space<vmem>>, vector<8x32xf32>
    tpu.vector_store %arg11[%c40_95, %c32_96], %118 {strides = array<i32>} : memref<64x64xf32, #tpu.memory_space<vmem>>, vector<8x32xf32>,
    %120 = vector.extract_strided_slice %105 {offsets = [8, 32], sizes = [8, 32], strides = [1, 1]} : vector<64x64xf32> to vector<8x32xf32>
    %c48_97 = arith.constant 48 : index
    %c32_98 = arith.constant 32 : index
    %121 = vector.load %arg11[%c48_97, %c32_98] : memref<64x64xf32, #tpu.memory_space<vmem>>, vector<8x32xf32>
    tpu.vector_store %arg11[%c48_97, %c32_98], %120 {strides = array<i32>} : memref<64x64xf32, #tpu.memory_space<vmem>>, vector<8x32xf32>,
    %122 = vector.extract_strided_slice %105 {offsets = [0, 32], sizes = [8, 32], strides = [1, 1]} : vector<64x64xf32> to vector<8x32xf32>
    %c56_99 = arith.constant 56 : index
    %c32_100 = arith.constant 32 : index
    %123 = vector.load %arg11[%c56_99, %c32_100] : memref<64x64xf32, #tpu.memory_space<vmem>>, vector<8x32xf32>
    tpu.vector_store %arg11[%c56_99, %c32_100], %122 {strides = array<i32>} : memref<64x64xf32, #tpu.memory_space<vmem>>, vector<8x32xf32>,
    %c1 = arith.constant 1 : index
    %c0_101 = arith.constant 0 : index
    %c0_102 = arith.constant 0 : index
    %124 = vector.load %arg7[%c1, %c0_101, %c0_102] : memref<3x64x64xbf16, #tpu.memory_space<vmem>>, vector<1x64x64xbf16>
    %125 = vector.shape_cast %124 : vector<1x64x64xbf16> to vector<64x64xbf16>
    %cst_103 = arith.constant 0.000000e+00 : f32
    %126 = vector.broadcast %cst_103 : f32 to vector<8x64xf32>
    %c0_104 = arith.constant 0 : index
    %c0_105 = arith.constant 0 : index
    %127 = vector.load %arg11[%c0_104, %c0_105] : memref<64x64xf32, #tpu.memory_space<vmem>>, vector<8x64xf32>
    %128 = arith.truncf %126 : vector<8x64xf32> to vector<8x64xbf16>
    %cst_106 = arith.constant dense<0.000000e+00> : vector<8x64xf32>
    %129 = tpu.matmul %128, %125, %cst_106 {dimension_numbers = #tpu.dot_dimension_numbers<[1], [0], [0], [1], [0, 0, 1, 1], [], []>} : vector<8x64xbf16>, vector<64x64xbf16>, vector<8x64xf32> -> vector<8x64xf32>
    %130 = arith.addf %127, %129 : vector<8x64xf32>
    %131 = math.tanh %130 : vector<8x64xf32>
    %132 = vector.extract_strided_slice %131 {offsets = [0, 0], sizes = [8, 32], strides = [1, 1]} : vector<8x64xf32> to vector<8x32xf32>
    %c0_107 = arith.constant 0 : index
    %c0_108 = arith.constant 0 : index
    %133 = vector.load %arg12[%c0_107, %c0_108] : memref<64x64xf32, #tpu.memory_space<vmem>>, vector<8x32xf32>
    tpu.vector_store %arg12[%c0_107, %c0_108], %132 {strides = array<i32>} : memref<64x64xf32, #tpu.memory_space<vmem>>, vector<8x32xf32>,
    %134 = vector.extract_strided_slice %131 {offsets = [0, 32], sizes = [8, 32], strides = [1, 1]} : vector<8x64xf32> to vector<8x32xf32>
    %c56_109 = arith.constant 56 : index
    %c32_110 = arith.constant 32 : index
    %135 = vector.load %arg12[%c56_109, %c32_110] : memref<64x64xf32, #tpu.memory_space<vmem>>, vector<8x32xf32>
    tpu.vector_store %arg12[%c56_109, %c32_110], %134 {strides = array<i32>} : memref<64x64xf32, #tpu.memory_space<vmem>>, vector<8x32xf32>,
    %c8_111 = arith.constant 8 : index
    %c0_112 = arith.constant 0 : index
    %136 = vector.load %arg11[%c8_111, %c0_112] : memref<64x64xf32, #tpu.memory_space<vmem>>, vector<8x64xf32>
    %137 = arith.truncf %131 : vector<8x64xf32> to vector<8x64xbf16>
    %cst_113 = arith.constant dense<0.000000e+00> : vector<8x64xf32>
    %138 = tpu.matmul %137, %125, %cst_113 {dimension_numbers = #tpu.dot_dimension_numbers<[1], [0], [0], [1], [0, 0, 1, 1], [], []>} : vector<8x64xbf16>, vector<64x64xbf16>, vector<8x64xf32> -> vector<8x64xf32>
    %139 = arith.addf %136, %138 : vector<8x64xf32>
    %140 = math.tanh %139 : vector<8x64xf32>
    %141 = vector.extract_strided_slice %140 {offsets = [0, 0], sizes = [8, 32], strides = [1, 1]} : vector<8x64xf32> to vector<8x32xf32>
    %c8_114 = arith.constant 8 : index
    %c0_115 = arith.constant 0 : index
    %142 = vector.load %arg12[%c8_114, %c0_115] : memref<64x64xf32, #tpu.memory_space<vmem>>, vector<8x32xf32>
    tpu.vector_store %arg12[%c8_114, %c0_115], %141 {strides = array<i32>} : memref<64x64xf32, #tpu.memory_space<vmem>>, vector<8x32xf32>,
    %143 = vector.extract_strided_slice %140 {offsets = [0, 32], sizes = [8, 32], strides = [1, 1]} : vector<8x64xf32> to vector<8x32xf32>
    %c48_116 = arith.constant 48 : index
    %c32_117 = arith.constant 32 : index
    %144 = vector.load %arg12[%c48_116, %c32_117] : memref<64x64xf32, #tpu.memory_space<vmem>>, vector<8x32xf32>
    tpu.vector_store %arg12[%c48_116, %c32_117], %143 {strides = array<i32>} : memref<64x64xf32, #tpu.memory_space<vmem>>, vector<8x32xf32>,
    %c16_118 = arith.constant 16 : index
    %c0_119 = arith.constant 0 : index
    %145 = vector.load %arg11[%c16_118, %c0_119] : memref<64x64xf32, #tpu.memory_space<vmem>>, vector<8x64xf32>
    %146 = arith.truncf %140 : vector<8x64xf32> to vector<8x64xbf16>
    %cst_120 = arith.constant dense<0.000000e+00> : vector<8x64xf32>
    %147 = tpu.matmul %146, %125, %cst_120 {dimension_numbers = #tpu.dot_dimension_numbers<[1], [0], [0], [1], [0, 0, 1, 1], [], []>} : vector<8x64xbf16>, vector<64x64xbf16>, vector<8x64xf32> -> vector<8x64xf32>
    %148 = arith.addf %145, %147 : vector<8x64xf32>
    %149 = math.tanh %148 : vector<8x64xf32>
    %150 = vector.extract_strided_slice %149 {offsets = [0, 0], sizes = [8, 32], strides = [1, 1]} : vector<8x64xf32> to vector<8x32xf32>
    %c16_121 = arith.constant 16 : index
    %c0_122 = arith.constant 0 : index
    %151 = vector.load %arg12[%c16_121, %c0_122] : memref<64x64xf32, #tpu.memory_space<vmem>>, vector<8x32xf32>
    tpu.vector_store %arg12[%c16_121, %c0_122], %150 {strides = array<i32>} : memref<64x64xf32, #tpu.memory_space<vmem>>, vector<8x32xf32>,
    %152 = vector.extract_strided_slice %149 {offsets = [0, 32], sizes = [8, 32], strides = [1, 1]} : vector<8x64xf32> to vector<8x32xf32>
    %c40_123 = arith.constant 40 : index
    %c32_124 = arith.constant 32 : index
    %153 = vector.load %arg12[%c40_123, %c32_124] : memref<64x64xf32, #tpu.memory_space<vmem>>, vector<8x32xf32>
    tpu.vector_store %arg12[%c40_123, %c32_124], %152 {strides = array<i32>} : memref<64x64xf32, #tpu.memory_space<vmem>>, vector<8x32xf32>,
    %c24_125 = arith.constant 24 : index
    %c0_126 = arith.constant 0 : index
    %154 = vector.load %arg11[%c24_125, %c0_126] : memref<64x64xf32, #tpu.memory_space<vmem>>, vector<8x64xf32>
    %155 = arith.truncf %149 : vector<8x64xf32> to vector<8x64xbf16>
    %cst_127 = arith.constant dense<0.000000e+00> : vector<8x64xf32>
    %156 = tpu.matmul %155, %125, %cst_127 {dimension_numbers = #tpu.dot_dimension_numbers<[1], [0], [0], [1], [0, 0, 1, 1], [], []>} : vector<8x64xbf16>, vector<64x64xbf16>, vector<8x64xf32> -> vector<8x64xf32>
    %157 = arith.addf %154, %156 : vector<8x64xf32>
    %158 = math.tanh %157 : vector<8x64xf32>
    %159 = vector.extract_strided_slice %158 {offsets = [0, 0], sizes = [8, 32], strides = [1, 1]} : vector<8x64xf32> to vector<8x32xf32>
    %c24_128 = arith.constant 24 : index
    %c0_129 = arith.constant 0 : index
    %160 = vector.load %arg12[%c24_128, %c0_129] : memref<64x64xf32, #tpu.memory_space<vmem>>, vector<8x32xf32>
    tpu.vector_store %arg12[%c24_128, %c0_129], %159 {strides = array<i32>} : memref<64x64xf32, #tpu.memory_space<vmem>>, vector<8x32xf32>,
    %161 = vector.extract_strided_slice %158 {offsets = [0, 32], sizes = [8, 32], strides = [1, 1]} : vector<8x64xf32> to vector<8x32xf32>
    %c32_130 = arith.constant 32 : index
    %c32_131 = arith.constant 32 : index
    %162 = vector.load %arg12[%c32_130, %c32_131] : memref<64x64xf32, #tpu.memory_space<vmem>>, vector<8x32xf32>
    tpu.vector_store %arg12[%c32_130, %c32_131], %161 {strides = array<i32>} : memref<64x64xf32, #tpu.memory_space<vmem>>, vector<8x32xf32>,
    %c32_132 = arith.constant 32 : index
    %c0_133 = arith.constant 0 : index
    %163 = vector.load %arg11[%c32_132, %c0_133] : memref<64x64xf32, #tpu.memory_space<vmem>>, vector<8x64xf32>
    %164 = arith.truncf %158 : vector<8x64xf32> to vector<8x64xbf16>
    %cst_134 = arith.constant dense<0.000000e+00> : vector<8x64xf32>
    %165 = tpu.matmul %164, %125, %cst_134 {dimension_numbers = #tpu.dot_dimension_numbers<[1], [0], [0], [1], [0, 0, 1, 1], [], []>} : vector<8x64xbf16>, vector<64x64xbf16>, vector<8x64xf32> -> vector<8x64xf32>
    %166 = arith.addf %163, %165 : vector<8x64xf32>
    %167 = math.tanh %166 : vector<8x64xf32>
    %168 = vector.extract_strided_slice %167 {offsets = [0, 0], sizes = [8, 32], strides = [1, 1]} : vector<8x64xf32> to vector<8x32xf32>
    %c32_135 = arith.constant 32 : index
    %c0_136 = arith.constant 0 : index
    %169 = vector.load %arg12[%c32_135, %c0_136] : memref<64x64xf32, #tpu.memory_space<vmem>>, vector<8x32xf32>
    tpu.vector_store %arg12[%c32_135, %c0_136], %168 {strides = array<i32>} : memref<64x64xf32, #tpu.memory_space<vmem>>, vector<8x32xf32>,
    %170 = vector.extract_strided_slice %167 {offsets = [0, 32], sizes = [8, 32], strides = [1, 1]} : vector<8x64xf32> to vector<8x32xf32>
    %c24_137 = arith.constant 24 : index
    %c32_138 = arith.constant 32 : index
    %171 = vector.load %arg12[%c24_137, %c32_138] : memref<64x64xf32, #tpu.memory_space<vmem>>, vector<8x32xf32>
    tpu.vector_store %arg12[%c24_137, %c32_138], %170 {strides = array<i32>} : memref<64x64xf32, #tpu.memory_space<vmem>>, vector<8x32xf32>,
    %c40_139 = arith.constant 40 : index
    %c0_140 = arith.constant 0 : index
    %172 = vector.load %arg11[%c40_139, %c0_140] : memref<64x64xf32, #tpu.memory_space<vmem>>, vector<8x64xf32>
    %173 = arith.truncf %167 : vector<8x64xf32> to vector<8x64xbf16>
    %cst_141 = arith.constant dense<0.000000e+00> : vector<8x64xf32>
    %174 = tpu.matmul %173, %125, %cst_141 {dimension_numbers = #tpu.dot_dimension_numbers<[1], [0], [0], [1], [0, 0, 1, 1], [], []>} : vector<8x64xbf16>, vector<64x64xbf16>, vector<8x64xf32> -> vector<8x64xf32>
    %175 = arith.addf %172, %174 : vector<8x64xf32>
    %176 = math.tanh %175 : vector<8x64xf32>
    %177 = vector.extract_strided_slice %176 {offsets = [0, 0], sizes = [8, 32], strides = [1, 1]} : vector<8x64xf32> to vector<8x32xf32>
    %c40_142 = arith.constant 40 : index
    %c0_143 = arith.constant 0 : index
    %178 = vector.load %arg12[%c40_142, %c0_143] : memref<64x64xf32, #tpu.memory_space<vmem>>, vector<8x32xf32>
    tpu.vector_store %arg12[%c40_142, %c0_143], %177 {strides = array<i32>} : memref<64x64xf32, #tpu.memory_space<vmem>>, vector<8x32xf32>,
    %179 = vector.extract_strided_slice %176 {offsets = [0, 32], sizes = [8, 32], strides = [1, 1]} : vector<8x64xf32> to vector<8x32xf32>
    %c16_144 = arith.constant 16 : index
    %c32_145 = arith.constant 32 : index
    %180 = vector.load %arg12[%c16_144, %c32_145] : memref<64x64xf32, #tpu.memory_space<vmem>>, vector<8x32xf32>
    tpu.vector_store %arg12[%c16_144, %c32_145], %179 {strides = array<i32>} : memref<64x64xf32, #tpu.memory_space<vmem>>, vector<8x32xf32>,
    %c48_146 = arith.constant 48 : index
    %c0_147 = arith.constant 0 : index
    %181 = vector.load %arg11[%c48_146, %c0_147] : memref<64x64xf32, #tpu.memory_space<vmem>>, vector<8x64xf32>
    %182 = arith.truncf %176 : vector<8x64xf32> to vector<8x64xbf16>
    %cst_148 = arith.constant dense<0.000000e+00> : vector<8x64xf32>
    %183 = tpu.matmul %182, %125, %cst_148 {dimension_numbers = #tpu.dot_dimension_numbers<[1], [0], [0], [1], [0, 0, 1, 1], [], []>} : vector<8x64xbf16>, vector<64x64xbf16>, vector<8x64xf32> -> vector<8x64xf32>
    %184 = arith.addf %181, %183 : vector<8x64xf32>
    %185 = math.tanh %184 : vector<8x64xf32>
    %186 = vector.extract_strided_slice %185 {offsets = [0, 0], sizes = [8, 32], strides = [1, 1]} : vector<8x64xf32> to vector<8x32xf32>
    %c48_149 = arith.constant 48 : index
    %c0_150 = arith.constant 0 : index
    %187 = vector.load %arg12[%c48_149, %c0_150] : memref<64x64xf32, #tpu.memory_space<vmem>>, vector<8x32xf32>
    tpu.vector_store %arg12[%c48_149, %c0_150], %186 {strides = array<i32>} : memref<64x64xf32, #tpu.memory_space<vmem>>, vector<8x32xf32>,
    %188 = vector.extract_strided_slice %185 {offsets = [0, 32], sizes = [8, 32], strides = [1, 1]} : vector<8x64xf32> to vector<8x32xf32>
    %c8_151 = arith.constant 8 : index
    %c32_152 = arith.constant 32 : index
    %189 = vector.load %arg12[%c8_151, %c32_152] : memref<64x64xf32, #tpu.memory_space<vmem>>, vector<8x32xf32>
    tpu.vector_store %arg12[%c8_151, %c32_152], %188 {strides = array<i32>} : memref<64x64xf32, #tpu.memory_space<vmem>>, vector<8x32xf32>,
    %c56_153 = arith.constant 56 : index
    %c0_154 = arith.constant 0 : index
    %190 = vector.load %arg11[%c56_153, %c0_154] : memref<64x64xf32, #tpu.memory_space<vmem>>, vector<8x64xf32>
    %191 = arith.truncf %185 : vector<8x64xf32> to vector<8x64xbf16>
    %cst_155 = arith.constant dense<0.000000e+00> : vector<8x64xf32>
    %192 = tpu.matmul %191, %125, %cst_155 {dimension_numbers = #tpu.dot_dimension_numbers<[1], [0], [0], [1], [0, 0, 1, 1], [], []>} : vector<8x64xbf16>, vector<64x64xbf16>, vector<8x64xf32> -> vector<8x64xf32>
    %193 = arith.addf %190, %192 : vector<8x64xf32>
    %194 = math.tanh %193 : vector<8x64xf32>
    %195 = vector.extract_strided_slice %194 {offsets = [0, 0], sizes = [8, 32], strides = [1, 1]} : vector<8x64xf32> to vector<8x32xf32>
    %c56_156 = arith.constant 56 : index
    %c0_157 = arith.constant 0 : index
    %196 = vector.load %arg12[%c56_156, %c0_157] : memref<64x64xf32, #tpu.memory_space<vmem>>, vector<8x32xf32>
    tpu.vector_store %arg12[%c56_156, %c0_157], %195 {strides = array<i32>} : memref<64x64xf32, #tpu.memory_space<vmem>>, vector<8x32xf32>,
    %197 = vector.extract_strided_slice %194 {offsets = [0, 32], sizes = [8, 32], strides = [1, 1]} : vector<8x64xf32> to vector<8x32xf32>
    %c0_158 = arith.constant 0 : index
    %c32_159 = arith.constant 32 : index
    %198 = vector.load %arg12[%c0_158, %c32_159] : memref<64x64xf32, #tpu.memory_space<vmem>>, vector<8x32xf32>
    tpu.vector_store %arg12[%c0_158, %c32_159], %197 {strides = array<i32>} : memref<64x64xf32, #tpu.memory_space<vmem>>, vector<8x32xf32>,
    %c0_160 = arith.constant 0 : index
    %c0_161 = arith.constant 0 : index
    %199 = vector.load %arg12[%c0_160, %c0_161] : memref<64x64xf32, #tpu.memory_space<vmem>>, vector<64x64xf32>
    %200 = arith.truncf %199 : vector<64x64xf32> to vector<64x64xbf16>
    %c0_162 = arith.constant 0 : index
    %c0_163 = arith.constant 0 : index
    %201 = vector.load %arg5[%c0_162, %c0_163] : memref<64x64xbf16, #tpu.memory_space<vmem>>, vector<64x64xbf16>
    %cst_164 = arith.constant dense<0.000000e+00> : vector<64x64xf32>
    %202 = tpu.matmul %200, %201, %cst_164 {dimension_numbers = #tpu.dot_dimension_numbers<[1], [0], [0], [1], [0, 0, 1, 1], [], []>} : vector<64x64xbf16>, vector<64x64xbf16>, vector<64x64xf32> -> vector<64x64xf32>
    %c0_165 = arith.constant 0 : index
    %c0_166 = arith.constant 0 : index
    %203 = vector.load %arg6[%c0_165, %c0_166] : memref<1x64xf32, #tpu.memory_space<vmem>>, vector<1x64xf32>
    %204 = vector.broadcast %203 : vector<1x64xf32> to vector<64x64xf32>
    %205 = arith.addf %202, %204 : vector<64x64xf32>
    %206 = vector.extract_strided_slice %205 {offsets = [0, 0], sizes = [64, 32], strides = [1, 1]} : vector<64x64xf32> to vector<64x32xf32>
    %c0_167 = arith.constant 0 : index
    %c0_168 = arith.constant 0 : index
    %207 = vector.load %arg11[%c0_167, %c0_168] : memref<64x64xf32, #tpu.memory_space<vmem>>, vector<64x32xf32>
    tpu.vector_store %arg11[%c0_167, %c0_168], %206 {strides = array<i32>} : memref<64x64xf32, #tpu.memory_space<vmem>>, vector<64x32xf32>,
    %208 = vector.extract_strided_slice %205 {offsets = [56, 32], sizes = [8, 32], strides = [1, 1]} : vector<64x64xf32> to vector<8x32xf32>
    %c0_169 = arith.constant 0 : index
    %c32_170 = arith.constant 32 : index
    %209 = vector.load %arg11[%c0_169, %c32_170] : memref<64x64xf32, #tpu.memory_space<vmem>>, vector<8x32xf32>
    tpu.vector_store %arg11[%c0_169, %c32_170], %208 {strides = array<i32>} : memref<64x64xf32, #tpu.memory_space<vmem>>, vector<8x32xf32>,
    %210 = vector.extract_strided_slice %205 {offsets = [48, 32], sizes = [8, 32], strides = [1, 1]} : vector<64x64xf32> to vector<8x32xf32>
    %c8_171 = arith.constant 8 : index
    %c32_172 = arith.constant 32 : index
    %211 = vector.load %arg11[%c8_171, %c32_172] : memref<64x64xf32, #tpu.memory_space<vmem>>, vector<8x32xf32>
    tpu.vector_store %arg11[%c8_171, %c32_172], %210 {strides = array<i32>} : memref<64x64xf32, #tpu.memory_space<vmem>>, vector<8x32xf32>,
    %212 = vector.extract_strided_slice %205 {offsets = [40, 32], sizes = [8, 32], strides = [1, 1]} : vector<64x64xf32> to vector<8x32xf32>
    %c16_173 = arith.constant 16 : index
    %c32_174 = arith.constant 32 : index
    %213 = vector.load %arg11[%c16_173, %c32_174] : memref<64x64xf32, #tpu.memory_space<vmem>>, vector<8x32xf32>
    tpu.vector_store %arg11[%c16_173, %c32_174], %212 {strides = array<i32>} : memref<64x64xf32, #tpu.memory_space<vmem>>, vector<8x32xf32>,
    %214 = vector.extract_strided_slice %205 {offsets = [32, 32], sizes = [8, 32], strides = [1, 1]} : vector<64x64xf32> to vector<8x32xf32>
    %c24_175 = arith.constant 24 : index
    %c32_176 = arith.constant 32 : index
    %215 = vector.load %arg11[%c24_175, %c32_176] : memref<64x64xf32, #tpu.memory_space<vmem>>, vector<8x32xf32>
    tpu.vector_store %arg11[%c24_175, %c32_176], %214 {strides = array<i32>} : memref<64x64xf32, #tpu.memory_space<vmem>>, vector<8x32xf32>,
    %216 = vector.extract_strided_slice %205 {offsets = [24, 32], sizes = [8, 32], strides = [1, 1]} : vector<64x64xf32> to vector<8x32xf32>
    %c32_177 = arith.constant 32 : index
    %c32_178 = arith.constant 32 : index
    %217 = vector.load %arg11[%c32_177, %c32_178] : memref<64x64xf32, #tpu.memory_space<vmem>>, vector<8x32xf32>
    tpu.vector_store %arg11[%c32_177, %c32_178], %216 {strides = array<i32>} : memref<64x64xf32, #tpu.memory_space<vmem>>, vector<8x32xf32>,
    %218 = vector.extract_strided_slice %205 {offsets = [16, 32], sizes = [8, 32], strides = [1, 1]} : vector<64x64xf32> to vector<8x32xf32>
    %c40_179 = arith.constant 40 : index
    %c32_180 = arith.constant 32 : index
    %219 = vector.load %arg11[%c40_179, %c32_180] : memref<64x64xf32, #tpu.memory_space<vmem>>, vector<8x32xf32>
    tpu.vector_store %arg11[%c40_179, %c32_180], %218 {strides = array<i32>} : memref<64x64xf32, #tpu.memory_space<vmem>>, vector<8x32xf32>,
    %220 = vector.extract_strided_slice %205 {offsets = [8, 32], sizes = [8, 32], strides = [1, 1]} : vector<64x64xf32> to vector<8x32xf32>
    %c48_181 = arith.constant 48 : index
    %c32_182 = arith.constant 32 : index
    %221 = vector.load %arg11[%c48_181, %c32_182] : memref<64x64xf32, #tpu.memory_space<vmem>>, vector<8x32xf32>
    tpu.vector_store %arg11[%c48_181, %c32_182], %220 {strides = array<i32>} : memref<64x64xf32, #tpu.memory_space<vmem>>, vector<8x32xf32>,
    %222 = vector.extract_strided_slice %205 {offsets = [0, 32], sizes = [8, 32], strides = [1, 1]} : vector<64x64xf32> to vector<8x32xf32>
    %c56_183 = arith.constant 56 : index
    %c32_184 = arith.constant 32 : index
    %223 = vector.load %arg11[%c56_183, %c32_184] : memref<64x64xf32, #tpu.memory_space<vmem>>, vector<8x32xf32>
    tpu.vector_store %arg11[%c56_183, %c32_184], %222 {strides = array<i32>} : memref<64x64xf32, #tpu.memory_space<vmem>>, vector<8x32xf32>,
    %c2 = arith.constant 2 : index
    %c0_185 = arith.constant 0 : index
    %c0_186 = arith.constant 0 : index
    %224 = vector.load %arg7[%c2, %c0_185, %c0_186] : memref<3x64x64xbf16, #tpu.memory_space<vmem>>, vector<1x64x64xbf16>
    %225 = vector.shape_cast %224 : vector<1x64x64xbf16> to vector<64x64xbf16>
    %cst_187 = arith.constant 0.000000e+00 : f32
    %226 = vector.broadcast %cst_187 : f32 to vector<8x64xf32>
    %c0_188 = arith.constant 0 : index
    %c0_189 = arith.constant 0 : index
    %227 = vector.load %arg11[%c0_188, %c0_189] : memref<64x64xf32, #tpu.memory_space<vmem>>, vector<8x64xf32>
    %228 = arith.truncf %226 : vector<8x64xf32> to vector<8x64xbf16>
    %cst_190 = arith.constant dense<0.000000e+00> : vector<8x64xf32>
    %229 = tpu.matmul %228, %225, %cst_190 {dimension_numbers = #tpu.dot_dimension_numbers<[1], [0], [0], [1], [0, 0, 1, 1], [], []>} : vector<8x64xbf16>, vector<64x64xbf16>, vector<8x64xf32> -> vector<8x64xf32>
    %230 = arith.addf %227, %229 : vector<8x64xf32>
    %231 = math.tanh %230 : vector<8x64xf32>
    %232 = vector.extract_strided_slice %231 {offsets = [0, 0], sizes = [8, 32], strides = [1, 1]} : vector<8x64xf32> to vector<8x32xf32>
    %c0_191 = arith.constant 0 : index
    %c0_192 = arith.constant 0 : index
    %233 = vector.load %arg12[%c0_191, %c0_192] : memref<64x64xf32, #tpu.memory_space<vmem>>, vector<8x32xf32>
    tpu.vector_store %arg12[%c0_191, %c0_192], %232 {strides = array<i32>} : memref<64x64xf32, #tpu.memory_space<vmem>>, vector<8x32xf32>,
    %234 = vector.extract_strided_slice %231 {offsets = [0, 32], sizes = [8, 32], strides = [1, 1]} : vector<8x64xf32> to vector<8x32xf32>
    %c56_193 = arith.constant 56 : index
    %c32_194 = arith.constant 32 : index
    %235 = vector.load %arg12[%c56_193, %c32_194] : memref<64x64xf32, #tpu.memory_space<vmem>>, vector<8x32xf32>
    tpu.vector_store %arg12[%c56_193, %c32_194], %234 {strides = array<i32>} : memref<64x64xf32, #tpu.memory_space<vmem>>, vector<8x32xf32>,
    %c8_195 = arith.constant 8 : index
    %c0_196 = arith.constant 0 : index
    %236 = vector.load %arg11[%c8_195, %c0_196] : memref<64x64xf32, #tpu.memory_space<vmem>>, vector<8x64xf32>
    %237 = arith.truncf %231 : vector<8x64xf32> to vector<8x64xbf16>
    %cst_197 = arith.constant dense<0.000000e+00> : vector<8x64xf32>
    %238 = tpu.matmul %237, %225, %cst_197 {dimension_numbers = #tpu.dot_dimension_numbers<[1], [0], [0], [1], [0, 0, 1, 1], [], []>} : vector<8x64xbf16>, vector<64x64xbf16>, vector<8x64xf32> -> vector<8x64xf32>
    %239 = arith.addf %236, %238 : vector<8x64xf32>
    %240 = math.tanh %239 : vector<8x64xf32>
    %241 = vector.extract_strided_slice %240 {offsets = [0, 0], sizes = [8, 32], strides = [1, 1]} : vector<8x64xf32> to vector<8x32xf32>
    %c8_198 = arith.constant 8 : index
    %c0_199 = arith.constant 0 : index
    %242 = vector.load %arg12[%c8_198, %c0_199] : memref<64x64xf32, #tpu.memory_space<vmem>>, vector<8x32xf32>
    tpu.vector_store %arg12[%c8_198, %c0_199], %241 {strides = array<i32>} : memref<64x64xf32, #tpu.memory_space<vmem>>, vector<8x32xf32>,
    %243 = vector.extract_strided_slice %240 {offsets = [0, 32], sizes = [8, 32], strides = [1, 1]} : vector<8x64xf32> to vector<8x32xf32>
    %c48_200 = arith.constant 48 : index
    %c32_201 = arith.constant 32 : index
    %244 = vector.load %arg12[%c48_200, %c32_201] : memref<64x64xf32, #tpu.memory_space<vmem>>, vector<8x32xf32>
    tpu.vector_store %arg12[%c48_200, %c32_201], %243 {strides = array<i32>} : memref<64x64xf32, #tpu.memory_space<vmem>>, vector<8x32xf32>,
    %c16_202 = arith.constant 16 : index
    %c0_203 = arith.constant 0 : index
    %245 = vector.load %arg11[%c16_202, %c0_203] : memref<64x64xf32, #tpu.memory_space<vmem>>, vector<8x64xf32>
    %246 = arith.truncf %240 : vector<8x64xf32> to vector<8x64xbf16>
    %cst_204 = arith.constant dense<0.000000e+00> : vector<8x64xf32>
    %247 = tpu.matmul %246, %225, %cst_204 {dimension_numbers = #tpu.dot_dimension_numbers<[1], [0], [0], [1], [0, 0, 1, 1], [], []>} : vector<8x64xbf16>, vector<64x64xbf16>, vector<8x64xf32> -> vector<8x64xf32>
    %248 = arith.addf %245, %247 : vector<8x64xf32>
    %249 = math.tanh %248 : vector<8x64xf32>
    %250 = vector.extract_strided_slice %249 {offsets = [0, 0], sizes = [8, 32], strides = [1, 1]} : vector<8x64xf32> to vector<8x32xf32>
    %c16_205 = arith.constant 16 : index
    %c0_206 = arith.constant 0 : index
    %251 = vector.load %arg12[%c16_205, %c0_206] : memref<64x64xf32, #tpu.memory_space<vmem>>, vector<8x32xf32>
    tpu.vector_store %arg12[%c16_205, %c0_206], %250 {strides = array<i32>} : memref<64x64xf32, #tpu.memory_space<vmem>>, vector<8x32xf32>,
    %252 = vector.extract_strided_slice %249 {offsets = [0, 32], sizes = [8, 32], strides = [1, 1]} : vector<8x64xf32> to vector<8x32xf32>
    %c40_207 = arith.constant 40 : index
    %c32_208 = arith.constant 32 : index
    %253 = vector.load %arg12[%c40_207, %c32_208] : memref<64x64xf32, #tpu.memory_space<vmem>>, vector<8x32xf32>
    tpu.vector_store %arg12[%c40_207, %c32_208], %252 {strides = array<i32>} : memref<64x64xf32, #tpu.memory_space<vmem>>, vector<8x32xf32>,
    %c24_209 = arith.constant 24 : index
    %c0_210 = arith.constant 0 : index
    %254 = vector.load %arg11[%c24_209, %c0_210] : memref<64x64xf32, #tpu.memory_space<vmem>>, vector<8x64xf32>
    %255 = arith.truncf %249 : vector<8x64xf32> to vector<8x64xbf16>
    %cst_211 = arith.constant dense<0.000000e+00> : vector<8x64xf32>
    %256 = tpu.matmul %255, %225, %cst_211 {dimension_numbers = #tpu.dot_dimension_numbers<[1], [0], [0], [1], [0, 0, 1, 1], [], []>} : vector<8x64xbf16>, vector<64x64xbf16>, vector<8x64xf32> -> vector<8x64xf32>
    %257 = arith.addf %254, %256 : vector<8x64xf32>
    %258 = math.tanh %257 : vector<8x64xf32>
    %259 = vector.extract_strided_slice %258 {offsets = [0, 0], sizes = [8, 32], strides = [1, 1]} : vector<8x64xf32> to vector<8x32xf32>
    %c24_212 = arith.constant 24 : index
    %c0_213 = arith.constant 0 : index
    %260 = vector.load %arg12[%c24_212, %c0_213] : memref<64x64xf32, #tpu.memory_space<vmem>>, vector<8x32xf32>
    tpu.vector_store %arg12[%c24_212, %c0_213], %259 {strides = array<i32>} : memref<64x64xf32, #tpu.memory_space<vmem>>, vector<8x32xf32>,
    %261 = vector.extract_strided_slice %258 {offsets = [0, 32], sizes = [8, 32], strides = [1, 1]} : vector<8x64xf32> to vector<8x32xf32>
    %c32_214 = arith.constant 32 : index
    %c32_215 = arith.constant 32 : index
    %262 = vector.load %arg12[%c32_214, %c32_215] : memref<64x64xf32, #tpu.memory_space<vmem>>, vector<8x32xf32>
    tpu.vector_store %arg12[%c32_214, %c32_215], %261 {strides = array<i32>} : memref<64x64xf32, #tpu.memory_space<vmem>>, vector<8x32xf32>,
    %c32_216 = arith.constant 32 : index
    %c0_217 = arith.constant 0 : index
    %263 = vector.load %arg11[%c32_216, %c0_217] : memref<64x64xf32, #tpu.memory_space<vmem>>, vector<8x64xf32>
    %264 = arith.truncf %258 : vector<8x64xf32> to vector<8x64xbf16>
    %cst_218 = arith.constant dense<0.000000e+00> : vector<8x64xf32>
    %265 = tpu.matmul %264, %225, %cst_218 {dimension_numbers = #tpu.dot_dimension_numbers<[1], [0], [0], [1], [0, 0, 1, 1], [], []>} : vector<8x64xbf16>, vector<64x64xbf16>, vector<8x64xf32> -> vector<8x64xf32>
    %266 = arith.addf %263, %265 : vector<8x64xf32>
    %267 = math.tanh %266 : vector<8x64xf32>
    %268 = vector.extract_strided_slice %267 {offsets = [0, 0], sizes = [8, 32], strides = [1, 1]} : vector<8x64xf32> to vector<8x32xf32>
    %c32_219 = arith.constant 32 : index
    %c0_220 = arith.constant 0 : index
    %269 = vector.load %arg12[%c32_219, %c0_220] : memref<64x64xf32, #tpu.memory_space<vmem>>, vector<8x32xf32>
    tpu.vector_store %arg12[%c32_219, %c0_220], %268 {strides = array<i32>} : memref<64x64xf32, #tpu.memory_space<vmem>>, vector<8x32xf32>,
    %270 = vector.extract_strided_slice %267 {offsets = [0, 32], sizes = [8, 32], strides = [1, 1]} : vector<8x64xf32> to vector<8x32xf32>
    %c24_221 = arith.constant 24 : index
    %c32_222 = arith.constant 32 : index
    %271 = vector.load %arg12[%c24_221, %c32_222] : memref<64x64xf32, #tpu.memory_space<vmem>>, vector<8x32xf32>
    tpu.vector_store %arg12[%c24_221, %c32_222], %270 {strides = array<i32>} : memref<64x64xf32, #tpu.memory_space<vmem>>, vector<8x32xf32>,
    %c40_223 = arith.constant 40 : index
    %c0_224 = arith.constant 0 : index
    %272 = vector.load %arg11[%c40_223, %c0_224] : memref<64x64xf32, #tpu.memory_space<vmem>>, vector<8x64xf32>
    %273 = arith.truncf %267 : vector<8x64xf32> to vector<8x64xbf16>
    %cst_225 = arith.constant dense<0.000000e+00> : vector<8x64xf32>
    %274 = tpu.matmul %273, %225, %cst_225 {dimension_numbers = #tpu.dot_dimension_numbers<[1], [0], [0], [1], [0, 0, 1, 1], [], []>} : vector<8x64xbf16>, vector<64x64xbf16>, vector<8x64xf32> -> vector<8x64xf32>
    %275 = arith.addf %272, %274 : vector<8x64xf32>
    %276 = math.tanh %275 : vector<8x64xf32>
    %277 = vector.extract_strided_slice %276 {offsets = [0, 0], sizes = [8, 32], strides = [1, 1]} : vector<8x64xf32> to vector<8x32xf32>
    %c40_226 = arith.constant 40 : index
    %c0_227 = arith.constant 0 : index
    %278 = vector.load %arg12[%c40_226, %c0_227] : memref<64x64xf32, #tpu.memory_space<vmem>>, vector<8x32xf32>
    tpu.vector_store %arg12[%c40_226, %c0_227], %277 {strides = array<i32>} : memref<64x64xf32, #tpu.memory_space<vmem>>, vector<8x32xf32>,
    %279 = vector.extract_strided_slice %276 {offsets = [0, 32], sizes = [8, 32], strides = [1, 1]} : vector<8x64xf32> to vector<8x32xf32>
    %c16_228 = arith.constant 16 : index
    %c32_229 = arith.constant 32 : index
    %280 = vector.load %arg12[%c16_228, %c32_229] : memref<64x64xf32, #tpu.memory_space<vmem>>, vector<8x32xf32>
    tpu.vector_store %arg12[%c16_228, %c32_229], %279 {strides = array<i32>} : memref<64x64xf32, #tpu.memory_space<vmem>>, vector<8x32xf32>,
    %c48_230 = arith.constant 48 : index
    %c0_231 = arith.constant 0 : index
    %281 = vector.load %arg11[%c48_230, %c0_231] : memref<64x64xf32, #tpu.memory_space<vmem>>, vector<8x64xf32>
    %282 = arith.truncf %276 : vector<8x64xf32> to vector<8x64xbf16>
    %cst_232 = arith.constant dense<0.000000e+00> : vector<8x64xf32>
    %283 = tpu.matmul %282, %225, %cst_232 {dimension_numbers = #tpu.dot_dimension_numbers<[1], [0], [0], [1], [0, 0, 1, 1], [], []>} : vector<8x64xbf16>, vector<64x64xbf16>, vector<8x64xf32> -> vector<8x64xf32>
    %284 = arith.addf %281, %283 : vector<8x64xf32>
    %285 = math.tanh %284 : vector<8x64xf32>
    %286 = vector.extract_strided_slice %285 {offsets = [0, 0], sizes = [8, 32], strides = [1, 1]} : vector<8x64xf32> to vector<8x32xf32>
    %c48_233 = arith.constant 48 : index
    %c0_234 = arith.constant 0 : index
    %287 = vector.load %arg12[%c48_233, %c0_234] : memref<64x64xf32, #tpu.memory_space<vmem>>, vector<8x32xf32>
    tpu.vector_store %arg12[%c48_233, %c0_234], %286 {strides = array<i32>} : memref<64x64xf32, #tpu.memory_space<vmem>>, vector<8x32xf32>,
    %288 = vector.extract_strided_slice %285 {offsets = [0, 32], sizes = [8, 32], strides = [1, 1]} : vector<8x64xf32> to vector<8x32xf32>
    %c8_235 = arith.constant 8 : index
    %c32_236 = arith.constant 32 : index
    %289 = vector.load %arg12[%c8_235, %c32_236] : memref<64x64xf32, #tpu.memory_space<vmem>>, vector<8x32xf32>
    tpu.vector_store %arg12[%c8_235, %c32_236], %288 {strides = array<i32>} : memref<64x64xf32, #tpu.memory_space<vmem>>, vector<8x32xf32>,
    %c56_237 = arith.constant 56 : index
    %c0_238 = arith.constant 0 : index
    %290 = vector.load %arg11[%c56_237, %c0_238] : memref<64x64xf32, #tpu.memory_space<vmem>>, vector<8x64xf32>
    %291 = arith.truncf %285 : vector<8x64xf32> to vector<8x64xbf16>
    %cst_239 = arith.constant dense<0.000000e+00> : vector<8x64xf32>
    %292 = tpu.matmul %291, %225, %cst_239 {dimension_numbers = #tpu.dot_dimension_numbers<[1], [0], [0], [1], [0, 0, 1, 1], [], []>} : vector<8x64xbf16>, vector<64x64xbf16>, vector<8x64xf32> -> vector<8x64xf32>
    %293 = arith.addf %290, %292 : vector<8x64xf32>
    %294 = math.tanh %293 : vector<8x64xf32>
    %295 = vector.extract_strided_slice %294 {offsets = [0, 0], sizes = [8, 32], strides = [1, 1]} : vector<8x64xf32> to vector<8x32xf32>
    %c56_240 = arith.constant 56 : index
    %c0_241 = arith.constant 0 : index
    %296 = vector.load %arg12[%c56_240, %c0_241] : memref<64x64xf32, #tpu.memory_space<vmem>>, vector<8x32xf32>
    tpu.vector_store %arg12[%c56_240, %c0_241], %295 {strides = array<i32>} : memref<64x64xf32, #tpu.memory_space<vmem>>, vector<8x32xf32>,
    %297 = vector.extract_strided_slice %294 {offsets = [0, 32], sizes = [8, 32], strides = [1, 1]} : vector<8x64xf32> to vector<8x32xf32>
    %c0_242 = arith.constant 0 : index
    %c32_243 = arith.constant 32 : index
    %298 = vector.load %arg12[%c0_242, %c32_243] : memref<64x64xf32, #tpu.memory_space<vmem>>, vector<8x32xf32>
    tpu.vector_store %arg12[%c0_242, %c32_243], %297 {strides = array<i32>} : memref<64x64xf32, #tpu.memory_space<vmem>>, vector<8x32xf32>,
    %c56_244 = arith.constant 56 : index
    %c0_245 = arith.constant 0 : index
    %299 = vector.load %arg12[%c56_244, %c0_245] : memref<64x64xf32, #tpu.memory_space<vmem>>, vector<8x64xf32>
    %c0_246 = arith.constant 0 : index
    %c0_247 = arith.constant 0 : index
    %300 = vector.load %arg8[%c0_246, %c0_247] : memref<1x64xf32, #tpu.memory_space<vmem>>, vector<1x64xf32>
    %301 = vector.broadcast %300 : vector<1x64xf32> to vector<8x64xf32>
    %302 = arith.mulf %299, %301 : vector<8x64xf32>
    %cst_248 = arith.constant dense<0.000000e+00> : vector<8xf32>
    %303 = vector.multi_reduction <add>, %302, %cst_248 [1] : vector<8x64xf32> to vector<8xf32>
    %304 = vector.shape_cast %303 : vector<8xf32> to vector<8x1xf32>
    %c0_249 = arith.constant 0 : index
    %c0_250 = arith.constant 0 : index
    %305 = vector.load %arg9[%c0_249, %c0_250] : memref<1x1xf32, #tpu.memory_space<vmem>>, vector<1x1xf32>
    %306 = vector.broadcast %305 : vector<1x1xf32> to vector<8x1xf32>
    %307 = arith.addf %304, %306 : vector<8x1xf32>
    %c0_251 = arith.constant 0 : index
    %c0_252 = arith.constant 0 : index
    %308 = vector.load %arg10[%c0_251, %c0_252] : memref<8x1xf32, #tpu.memory_space<vmem>>, vector<8x1xf32>
    tpu.vector_store %arg10[%c0_251, %c0_252], %307 {strides = array<i32>} : memref<8x1xf32, #tpu.memory_space<vmem>>, vector<8x1xf32>,
    return
  }
}

</mosaic_0001>

<bundles_post_ra>
// kernel: rnn_model_forward.1
= control target key start
LH: loop header
LB: loop body
LE: loop exit
PB: predicated region body
PF: predicated region fallthrough
CT: control target
= control target key end

     0   :  { %vm285_vm0 = vcmask 1045504   ;;  %vm272_vm1 = vcmask 359424   ;;  %v2746_v23 = vmov 0.0   ;;  %vm2747_vm2 = vmmov 0   ;;  %s3372_s1 = inlined_call_operand.vmem [shape: bf16[300,64], index: 1, kind: input, shape index: {}]   ;;  %s3373_s0 = inlined_call_operand.vmem [shape: bf16[64,300], index: 0, kind: input, shape index: {}]   ;;  %s3374_s7 = inlined_call_operand.vmem [shape: bf16[3,64,64], index: 7, kind: input, shape index: {}]   ;;  %s3375_s2 = inlined_call_operand.vmem [shape: f32[1,64], index: 2, kind: input, shape index: {}]   ;;  %s3376_s3 = inlined_call_operand.vmem [shape: bf16[64,64], index: 3, kind: input, shape index: {}]   ;;  %s3377_s4 = inlined_call_operand.vmem [shape: f32[1,64], index: 4, kind: input, shape index: {}]   ;;  %s3378_s5 = inlined_call_operand.vmem [shape: bf16[64,64], index: 5, kind: input, shape index: {}]   ;;  %s3379_s6 = inlined_call_operand.vmem [shape: f32[1,64], index: 6, kind: input, shape index: {}]   ;;  %s3380_s9 = inlined_call_operand.<no memory space> [shape: f32[1,1], index: 9, kind: input, shape index: {}]   ;;  %s3381_s8 = inlined_call_operand.vmem [shape: f32[1,64], index: 8, kind: input, shape index: {}]   ;;  %s3382_s10 = inlined_call_operand.vmem [shape: f32[8,1], index: 10, kind: output, shape index: {}]  }
   0x1   :  { %v2643_v0 = vld [vmem:[%s3372_s1 + $0x40] sm:$0xff]   ;;  %v2645_v2 = vld [vmem:[%s3372_s1 + $0x48] sm:$0xff]   ;;  %v2647_v4 = vld [vmem:[%s3372_s1 + $0x50] sm:$0xff]   ;;  %v2748_v34 = vmov 0   ;;  %vm419_vm3 = vcmask 261120   ;;  %vm428_vm4 = vcmask 523520  }
   0x2   :  { %v2644_v1 = vld [vmem:[%s3372_s1] sm:$0xff]   ;;  %2122 = vmatprep.subr.bf16.mxu0 %v2643_v0  ;;  %v2646_v3 = vld [vmem:[%s3372_s1 + $0x8] sm:$0xff]   ;;  %v2648_v5 = vld [vmem:[%s3372_s1 + $0x10] sm:$0xff]   ;;  %vm470_vm5 = vcmask 523264   ;;  %vm2011_vm6 = vcmask 7168  }
   0x3   :  { %2123 = vmatpush3.bf16.msra.mxu0 %v2644_v1  ;;  %v2649_v6 = vld [vmem:[%s3372_s1 + $0x58] sm:$0xff]   ;;  %v2651_v8 = vld [vmem:[%s3372_s1 + $0x60] sm:$0xff]   ;;  %v2653_v11 = vld [vmem:[%s3372_s1 + $0x68] sm:$0xff]  }
   0x4   :  { %2124 = vmatprep.subr.bf16.mxu0 %v2645_v2  ;;  %v2650_v7 = vld [vmem:[%s3372_s1 + $0x18] sm:$0xff]   ;;  %v2656_v9 = vld [vmem:[%s3372_s1 + $0x80] sm:$0xff]   ;;  %v2659_v12 = vld [vmem:[%s3372_s1 + $0x88] sm:$0xff]  }
   0x5   :  { %v2652_v10 = vld [vmem:[%s3372_s1 + $0x20] sm:$0xff]   ;;  %2305 = vmatprep.subr.bf16.mxu1 %v2656_v9  ;;  %v2654_v13 = vld [vmem:[%s3372_s1 + $0x28] sm:$0xff]   ;;  %v2655_v14 = vld [vmem:[%s3372_s1 + $0x70] sm:$0xff]  }
   0x6   :  { %2306 = vmatpush3.bf16.msra.mxu1 %v2656_v9  ;;  %v2663_v15 = vld [vmem:[%s3373_s0 + $0x4] ss:$12 sps:$4 sm:$0xff]   ;;  %v2665_v17 = vld [vmem:[%s3373_s0 + $0x8] ss:$12 sps:$4 sm:$0xff]   ;;  %v2666_v20 = vld [vmem:[%s3373_s0 + $0x20] ss:$12 sps:$4 sm:$0xff]  }
   0x7   :  { %2125 = vmatpush3.bf16.msra.mxu0 %v2646_v3  ;;  %2307 = vmatprep.subr.bf16.mxu1 %v2659_v12  ;;  %v2664_v16 = vld [vmem:[%s3372_s1 + $0x90] sm:$0x3f]   ;;  %v2658_v21 = vld [vmem:[%s3372_s1 + $0x78] sm:$0xff]   ;;  %v2661_v25 = vld [vmem:[%s3373_s0] ss:$12 sps:$4 sm:$0xff]  }
   0x8   :  { %2126 = vmatprep.subr.bf16.mxu0 %v2647_v4  ;;  %321 = vmatprep.mubr.bf16.mxu0 %v2663_v15  ;;  %v287_v18 = vsel %vm285_vm0, %v2664_v16, 0  ;;  %v2657_v19 = vld [vmem:[%s3372_s1 + $0x30] sm:$0xff]   ;;  %v2673_v22 = vld [vmem:[%s3373_s0 + $0x38] ss:$12 sps:$4 sm:$0xff]   ;;  %v2667_v27 = vld [vmem:[%s3373_s0 + $0x1c] ss:$12 sps:$4 sm:$0xff]  }
   0x9   :  { %2311 = vmatprep.mubr.msk.bf16.mxu1 %vm272_vm1, %v2665_v17  ;;  %v2660_v24 = vld [vmem:[%s3372_s1 + $0x38] sm:$0xff]   ;;  %v2883_v26 = vld [vmem:[%s3374_s7] sm:$0xff]   ;;  %v2892_v28 = vld [vmem:[%s3374_s7 + $0x8] sm:$0xff]  }
   0xa   :  { %2308 = vmatpush3.bf16.msra.mxu1 %v2659_v12  ;;  %v2674_v29 = vld [vmem:[%s3373_s0 + $0x50] ss:$12 sps:$4 sm:$0xff]   ;;  %v2669_v31 = vld [vmem:[%s3373_s0 + $0x18] ss:$12 sps:$4 sm:$0xff]   ;;  %v2670_v33 = vld [vmem:[%s3373_s0 + $0x34] ss:$12 sps:$4 sm:$0xff]  }
   0xb   :  { %2127 = vmatpush3.bf16.msra.mxu0 %v2648_v5  ;;  %2639 = vmatprep.subr.msk.bf16.mxu1 %vm285_vm0, %v2664_v16  ;;  %v2901_v30 = vld [vmem:[%s3374_s7 + $0x10] sm:$0xff]   ;;  %v2917_v32 = vld [vmem:[%s3374_s7 + $0x18] sm:$0xff]   ;;  %v2017_v44 = vld [vmem:[%s3375_s2] ss:$0 sm:$0xff] }
   0xc   :  { %2128 = vmatprep.subr.bf16.mxu0 %v2649_v6  ;;  %v2672_v35 = vld [vmem:[%s3373_s0 + $0x30] ss:$12 sps:$4 sm:$0xff]   ;;  %v2675_v36 = vld [vmem:[%s3373_s0 + $0x4c] ss:$12 sps:$4 sm:$0xff]   ;;  %v2678_v37 = vld [vmem:[%s3373_s0 + $0x48] ss:$12 sps:$4 sm:$0xff]  }
   0xe   :  { %2310 = vmatpush3.bf16.msra.mxu1 %v287_v18 }
   0xf   :  { %2129 = vmatpush3.bf16.msra.mxu0 %v2650_v7  ;;  %2319 = vmatprep.subr.bf16.mxu1 %v2746_v23 }
  0x10   :  { %2130 = vmatprep.subr.bf16.mxu0 %v2651_v8 }
  0x11   :  { %2312 = vmatmul.mubr.msk.bf16.vlgmr.msra.gmra.mrb[0].mxu1 %vm272_vm1, %v2666_v20 }
  0x12   :  { %2315 = vmatprep.mubr.msk.bf16.mxu1 %vm272_vm1, %v2673_v22  ;;  %2320 = vmatpush3.bf16.msra.mxu1 %v2883_v26 }
  0x13   :  { %2131 = vmatpush3.bf16.msra.mxu0 %v2652_v10  ;;  %2321 = vmatprep.subr.bf16.mxu1 %v2746_v23 }
  0x14   :  { %2132 = vmatprep.subr.bf16.mxu0 %v2653_v11 }
  0x16   :  { %2322 = vmatpush3.bf16.msra.mxu1 %v2892_v28 }
  0x17   :  { %2133 = vmatpush3.bf16.msra.mxu0 %v2654_v13  ;;  %2323 = vmatprep.subr.bf16.mxu1 %v2746_v23 }
  0x18   :  { %2134 = vmatprep.subr.bf16.mxu0 %v2655_v14 }
  0x19   :  { %2316 = vmatmul.mubr.msk.bf16.gmra.mrb[4].mxu1 %vm272_vm1, %v2674_v29 }
  0x1a   :  { %2327 = vmatprep.mubr.msk.bf16.mxu1 %vm2747_vm2, %v2746_v23  ;;  %2324 = vmatpush3.bf16.msra.mxu1 %v2901_v30 }
  0x1b   :  { %2135 = vmatpush3.bf16.msra.mxu0 %v2657_v19  ;;  %2325 = vmatprep.subr.bf16.mxu1 %v2746_v23 }
  0x1c   :  { %2136 = vmatprep.subr.bf16.mxu0 %v2658_v21 }
  0x1e   :  { %2326 = vmatpush3.bf16.msra.mxu1 %v2917_v32 }
  0x1f   :  { %2137 = vmatpush3.bf16.msra.mxu0 %v2660_v24  ;;  %2331 = vmatprep.subr.bf16.mxu1 %v2746_v23 }
  0x20   :  { %2355 = vmatprep.subr.bf16.mxu0 %v2746_v23 }
  0x21   :  { %2328 = vmatmul.mubr.bf16.vlgmr.msra.gmra.mrb[8].mxu1 %v2748_v34 }
  0x22   :  { %322 = vmatmul.mubr.bf16.vlgmr.msra.gmra.mrb[0].mxu0 %v2661_v25  ;;  %2332 = vmatpush3.bf16.msra.mxu1 %v2883_v26 }
  0x23   :  { %329 = vmatprep.mubr.bf16.mxu0 %v2667_v27  ;;  %2356 = vmatpush3.bf16.msra.mxu0 %v2883_v26 }
  0x24   :  { %2357 = vmatprep.subr.bf16.mxu0 %v2746_v23  ;;  %2339 = vmatprep.mubr.msk.bf16.mxu1 %vm2747_vm2, %v2746_v23 }
  0x25   :  { %2333 = vmatprep.subr.bf16.mxu1 %v2746_v23 }
  0x26   :  { %2334 = vmatpush3.bf16.msra.mxu1 %v2892_v28 }
  0x27   :  { %2358 = vmatpush3.bf16.msra.mxu0 %v2892_v28  ;;  %2335 = vmatprep.subr.bf16.mxu1 %v2746_v23 }
  0x28   :  { %2359 = vmatprep.subr.bf16.mxu0 %v2746_v23 }
  0x2a   :  { %330 = vmatmul.mubr.bf16.gmra.mrb[4].mxu0 %v2669_v31  ;;  %2336 = vmatpush3.bf16.msra.mxu1 %v2901_v30 }
  0x2b   :  { %337 = vmatprep.mubr.bf16.mxu0 %v2670_v33  ;;  %2360 = vmatpush3.bf16.msra.mxu0 %v2901_v30 }
  0x2c   :  { %2361 = vmatprep.subr.bf16.mxu0 %v2746_v23  ;;  %2337 = vmatprep.subr.bf16.mxu1 %v2746_v23 }
  0x2e   :  { %2338 = vmatpush3.bf16.msra.mxu1 %v2917_v32 }
  0x2f   :  { %2362 = vmatpush3.bf16.msra.mxu0 %v2917_v32  ;;  %2343 = vmatprep.subr.bf16.mxu1 %v2746_v23 }
  0x30   :  { %2379 = vmatprep.subr.bf16.mxu0 %v2746_v23 }
  0x32   :  { %338 = vmatmul.mubr.bf16.gmra.mrb[8].mxu0 %v2672_v35 }
  0x33   :  { %345 = vmatprep.mubr.bf16.mxu0 %v2675_v36 }
  0x3a   :  { %346 = vmatmul.mubr.bf16.gmra.mrb[12].mxu0 %v2678_v37 }
  0x3b   :  { %2363 = vmatprep.mubr.msk.bf16.mxu0 %vm2747_vm2, %v2746_v23 }
  0xe4   :  { %v2313_v38 = vpop.f32.mrb[0].mxu1 }
  0xe5   :  { %v388_v39 = vpop.f32.mrb[1].mxu1 }
  0xe6   :  { %v2314_v40 = vpop.f32.mrb[2].mxu1 }
  0xe7   :  { %v391_v41 = vpop.f32.mrb[3].mxu1 }
  0xec   :  { %v2317_v45 = vpop.f32.mrb[4].mxu1 }
  0xed   :  { %v404_v48 = vpop.f32.mrb[5].mxu1 }
  0xee   :  { %v2318_v50 = vpop.f32.mrb[6].mxu1 }
  0xef   :  { %v407_v53 = vpop.f32.mrb[7].mxu1 }
  0xf4   :  { %v508_v62 = vpop.f32.mrb[8].mxu1 }
  0xf5   :  { %v2138_v42 = vpop.f32.mrb[0].mxu0  ;;  %v2329_v1 = vpop.f32.mrb[9].mxu1 }
  0xf6   :  { %v2139_v43 = vpop.f32.mrb[1].mxu0  ;;  %v511_v2 = vpop.f32.mrb[10].mxu1 }
  0xf7   :  { %v2140_v46 = vadd.f32 %v2139_v43, %v2138_v42  ;;  %v2141_v47 = vpop.f32.mrb[2].mxu0  ;;  %v2330_v5 = vpop.f32.mrb[11].mxu1 }
  0xf8   :  { %v2142_v49 = vpop.f32.mrb[3].mxu0 }
  0xf9   :  { %v2143_v51 = vadd.f32 %v2142_v49, %v2141_v47  ;;  %v324_v52 = vadd.f32 %v2140_v46, %v2017_v44 }
  0xfb   :  { %v389_v54 = vadd.f32 %v388_v39, %v324_v52  ;;  %v327_v55 = vadd.f32 %v2143_v51, %v2017_v44 }
  0xfd   :  { %420 = vst.msk [vmem:[#allocation2] sm:$0xff] %vm419_vm3, %v389_v54  ;;  %v392_v56 = vadd.f32 %v391_v41, %v327_v55  ;;  %v2144_v57 = vpop.f32.mrb[4].mxu0 }
  0xfe   :  { %v2145_v58 = vpop.f32.mrb[5].mxu0 }
  0xff   :  { %421 = vst.msk [vmem:[#allocation2 + $0x8] sm:$0xff] %vm419_vm3, %v392_v56  ;;  %v2146_v59 = vadd.f32 %v2145_v58, %v2144_v57  ;;  %v2147_v60 = vpop.f32.mrb[6].mxu0 }
 0x100   :  { %v2148_v61 = vpop.f32.mrb[7].mxu0 }
 0x101   :  { %v332_v63 = vadd.f32 %v2146_v59, %v2017_v44  ;;  %v2149_v0 = vadd.f32 %v2148_v61, %v2147_v60 }
 0x103   :  { %v397_v3 = vadd.f32 %v2313_v38, %v332_v63  ;;  %v335_v4 = vadd.f32 %v2149_v0, %v2017_v44 }
 0x105   :  { %422 = vst.msk [vmem:[#allocation2 + $0x10] sm:$0xff] %vm419_vm3, %v397_v3  ;;  %v400_v6 = vadd.f32 %v2314_v40, %v335_v4  ;;  %v2150_v7 = vpop.f32.mrb[8].mxu0 }
 0x106   :  { %v2151_v8 = vpop.f32.mrb[9].mxu0 }
 0x107   :  { %423 = vst.msk [vmem:[#allocation2 + $0x18] sm:$0xff] %vm419_vm3, %v400_v6  ;;  %v2152_v9 = vadd.f32 %v2151_v8, %v2150_v7  ;;  %v2153_v10 = vpop.f32.mrb[10].mxu0 }
 0x108   :  { %v2154_v11 = vpop.f32.mrb[11].mxu0 }
 0x109   :  { %v2155_v12 = vadd.f32 %v2154_v11, %v2153_v10  ;;  %v340_v13 = vadd.f32 %v2152_v9, %v2017_v44 }
 0x10b   :  { %v405_v14 = vadd.f32 %v404_v48, %v340_v13  ;;  %v343_v15 = vadd.f32 %v2155_v12, %v2017_v44 }
 0x10d   :  { %424 = vst.msk [vmem:[#allocation2 + $0x20] sm:$0xff] %vm419_vm3, %v405_v14  ;;  %v408_v16 = vadd.f32 %v407_v53, %v343_v15  ;;  %v2156_v17 = vpop.f32.mrb[12].mxu0 }
 0x10e   :  { %432 = vst.msk [vmem:[#allocation2 + $0x18] sm:$0xff] %vm428_vm4, %v405_v14  ;;  %433 = vst.msk [vmem:[#allocation2 + $0x20] sm:$0xff] %vm428_vm4, %v400_v6  ;;  %v2157_v18 = vpop.f32.mrb[13].mxu0 }
 0x10f   :  { %425 = vst.msk [vmem:[#allocation2 + $0x28] sm:$0xff] %vm419_vm3, %v408_v16  ;;  %v2158_v19 = vadd.f32 %v2157_v18, %v2156_v17  ;;  %v2159_v20 = vpop.f32.mrb[14].mxu0  ;;  %v2682_v17 = vld [vmem:[%s3376_s3] sm:$0xff]   ;;  %v2683_v18 = vld [vmem:[%s3376_s3 + $0x8] sm:$0xff]  }
 0x110   :  { %431 = vst.msk [vmem:[#allocation2 + $0x10] sm:$0xff] %vm428_vm4, %v408_v16  ;;  %434 = vst.msk [vmem:[#allocation2 + $0x28] sm:$0xff] %vm428_vm4, %v397_v3  ;;  %v2160_v21 = vpop.f32.mrb[15].mxu0 }
 0x111   :  { %v348_v22 = vadd.f32 %v2158_v19, %v2017_v44  ;;  %v2161_v24 = vadd.f32 %v2160_v21, %v2159_v20  ;;  %v2684_v19 = vld [vmem:[%s3376_s3 + $0x10] sm:$0xff]   ;;  %v2685_v20 = vld [vmem:[%s3376_s3 + $0x18] sm:$0xff]   ;;  %v3061_v21 = vld [vmem:[%s3374_s7 + $0x20] sm:$0xff]  }
 0x113   :  { %v413_v25 = vadd.f32 %v2317_v45, %v348_v22  ;;  %v351_v27 = vadd.f32 %v2161_v24, %v2017_v44  ;;  %v3067_v22 = vld [vmem:[%s3374_s7 + $0x28] sm:$0xff]   ;;  %v3075_v24 = vld [vmem:[%s3374_s7 + $0x30] sm:$0xff]  }
 0x115   :  { %426 = vst.msk [vmem:[#allocation2 + $0x30] sm:$0xff] %vm419_vm3, %v413_v25  ;;  %v416_v29 = vadd.f32 %v2318_v50, %v351_v27  ;;  %v616_v53 = vld [vmem:[#allocation2 + $0x18] sm:$0xff]  ;;  %v665_v61 = vld [vmem:[#allocation2 + $0x20] sm:$0xff] }
 0x116   :  { %430 = vst.msk [vmem:[#allocation2 + $0x8] sm:$0xff] %vm428_vm4, %v413_v25  ;;  %435 = vst.msk [vmem:[#allocation2 + $0x30] sm:$0xff] %vm428_vm4, %v392_v56  ;;  %v3081_v25 = vld [vmem:[%s3374_s7 + $0x38] sm:$0xff]  }
 0x117   :  { %427 = vst.msk [vmem:[#allocation2 + $0x38] sm:$0xff] %vm419_vm3, %v416_v29  ;;  %v567_v45 = vld [vmem:[#allocation2 + $0x10] sm:$0xff]  ;;  %v714_v5 = vld [vmem:[#allocation2 + $0x28] sm:$0xff] }
 0x118   :  { %429 = vst.msk [vmem:[#allocation2] sm:$0xff] %vm428_vm4, %v416_v29  ;;  %436 = vst.msk [vmem:[#allocation2 + $0x38] sm:$0xff] %vm428_vm4, %v389_v54 }
 0x11d   :  { %v518_v37 = vld [vmem:[#allocation2 + $0x8] sm:$0xff] }
 0x11f   :  { %v445_v31 = vld [vmem:[#allocation2] sm:$0xff]  ;;  %v812_v27 = vld [vmem:[#allocation2 + $0x38] sm:$0xff] }
 0x120   :  { %v514_v33 = vadd.f32 %v508_v62, %v445_v31 }
 0x122   :  { %2698 = vtanh.f32 %v514_v33 }
 0x12c   :  { %v2699_v35 = vpop.eup %2698 }
 0x12d   :  { %516 = vst.msk [vmem:[#allocation3] sm:$0xff] %vm419_vm3, %v2699_v35  ;;  %v519_v36 = vpack.c.bf16 %v2699_v35, %v2699_v35 }
 0x12e   :  { %517 = vst.msk [vmem:[#allocation3 + $0x38] sm:$0xff] %vm428_vm4, %v2699_v35 }
 0x12f   :  { %2340 = vmatmul.mubr.msk.bf16.vlgmr.msra.gmra.mrb[12].mxu1 %vm470_vm5, %v519_v36 }
 0x130   :  { %2344 = vmatpush3.bf16.msra.mxu1 %v2883_v26  ;;  %2351 = vmatprep.mubr.msk.bf16.mxu1 %vm2747_vm2, %v2746_v23 }
 0x131   :  { %2345 = vmatprep.subr.bf16.mxu1 %v2746_v23 }
 0x134   :  { %2346 = vmatpush3.bf16.msra.mxu1 %v2892_v28 }
 0x135   :  { %2347 = vmatprep.subr.bf16.mxu1 %v2746_v23 }
 0x138   :  { %2348 = vmatpush3.bf16.msra.mxu1 %v2901_v30 }
 0x139   :  { %2349 = vmatprep.subr.bf16.mxu1 %v2746_v23 }
 0x13c   :  { %2350 = vmatpush3.bf16.msra.mxu1 %v2917_v32 }
 0x13d   :  { %2367 = vmatprep.subr.bf16.mxu1 %v2746_v23 }
 0x202   :  { %v557_v38 = vpop.f32.mrb[12].mxu1 }
 0x203   :  { %v563_v39 = vadd.f32 %v557_v38, %v518_v37  ;;  %v2341_v40 = vpop.f32.mrb[13].mxu1 }
 0x204   :  { %v560_v41 = vpop.f32.mrb[14].mxu1 }
 0x205   :  { %2700 = vtanh.f32 %v563_v39  ;;  %v2342_v42 = vpop.f32.mrb[15].mxu1 }
 0x20f   :  { %v2701_v43 = vpop.eup %2700 }
 0x210   :  { %565 = vst.msk [vmem:[#allocation3 + $0x8] sm:$0xff] %vm419_vm3, %v2701_v43  ;;  %v568_v44 = vpack.c.bf16 %v2701_v43, %v2701_v43 }
 0x211   :  { %566 = vst.msk [vmem:[#allocation3 + $0x30] sm:$0xff] %vm428_vm4, %v2701_v43 }
 0x212   :  { %2352 = vmatmul.mubr.msk.bf16.vlgmr.msra.gmra.mrb[16].mxu1 %vm470_vm5, %v568_v44 }
 0x213   :  { %2368 = vmatpush3.bf16.msra.mxu1 %v2883_v26  ;;  %2375 = vmatprep.mubr.msk.bf16.mxu1 %vm2747_vm2, %v2746_v23 }
 0x214   :  { %2369 = vmatprep.subr.bf16.mxu1 %v2746_v23 }
 0x217   :  { %2370 = vmatpush3.bf16.msra.mxu1 %v2892_v28 }
 0x218   :  { %2371 = vmatprep.subr.bf16.mxu1 %v2746_v23 }
 0x21b   :  { %2372 = vmatpush3.bf16.msra.mxu1 %v2901_v30 }
 0x21c   :  { %2373 = vmatprep.subr.bf16.mxu1 %v2746_v23 }
 0x21f   :  { %2374 = vmatpush3.bf16.msra.mxu1 %v2917_v32 }
 0x220   :  { %2391 = vmatprep.subr.bf16.mxu1 %v2746_v23 }
 0x2e5   :  { %v606_v46 = vpop.f32.mrb[16].mxu1 }
 0x2e6   :  { %v612_v47 = vadd.f32 %v606_v46, %v567_v45  ;;  %v2353_v48 = vpop.f32.mrb[17].mxu1 }
 0x2e7   :  { %v609_v49 = vpop.f32.mrb[18].mxu1 }
 0x2e8   :  { %2702 = vtanh.f32 %v612_v47  ;;  %v2354_v50 = vpop.f32.mrb[19].mxu1 }
 0x2f2   :  { %v2703_v51 = vpop.eup %2702 }
 0x2f3   :  { %614 = vst.msk [vmem:[#allocation3 + $0x10] sm:$0xff] %vm419_vm3, %v2703_v51  ;;  %v617_v52 = vpack.c.bf16 %v2703_v51, %v2703_v51 }
 0x2f4   :  { %615 = vst.msk [vmem:[#allocation3 + $0x28] sm:$0xff] %vm428_vm4, %v2703_v51 }
 0x2f5   :  { %2364 = vmatmul.mubr.msk.bf16.vlgmr.msra.gmra.mrb[16].mxu0 %vm470_vm5, %v617_v52 }
 0x2f6   :  { %2380 = vmatpush3.bf16.msra.mxu0 %v2883_v26  ;;  %2387 = vmatprep.mubr.msk.bf16.mxu0 %vm2747_vm2, %v2746_v23 }
 0x2f7   :  { %2381 = vmatprep.subr.bf16.mxu0 %v2746_v23 }
 0x2fa   :  { %2382 = vmatpush3.bf16.msra.mxu0 %v2892_v28 }
 0x2fb   :  { %2383 = vmatprep.subr.bf16.mxu0 %v2746_v23 }
 0x2fe   :  { %2384 = vmatpush3.bf16.msra.mxu0 %v2901_v30 }
 0x2ff   :  { %2385 = vmatprep.subr.bf16.mxu0 %v2746_v23 }
 0x302   :  { %2386 = vmatpush3.bf16.msra.mxu0 %v2917_v32 }
 0x303   :  { %2403 = vmatprep.subr.bf16.mxu0 %v2746_v23 }
 0x3c8   :  { %v655_v54 = vpop.f32.mrb[16].mxu0 }
 0x3c9   :  { %v661_v55 = vadd.f32 %v655_v54, %v616_v53  ;;  %v2365_v56 = vpop.f32.mrb[17].mxu0  ;;  %v2064_v54 = vld [vmem:[%s3377_s4] ss:$0 sm:$0xff] }
 0x3ca   :  { %v658_v57 = vpop.f32.mrb[18].mxu0 }
 0x3cb   :  { %2704 = vtanh.f32 %v661_v55  ;;  %v2366_v58 = vpop.f32.mrb[19].mxu0 }
 0x3d5   :  { %v2705_v59 = vpop.eup %2704 }
 0x3d6   :  { %663 = vst.msk [vmem:[#allocation3 + $0x18] sm:$0xff] %vm419_vm3, %v2705_v59  ;;  %v666_v60 = vpack.c.bf16 %v2705_v59, %v2705_v59 }
 0x3d7   :  { %664 = vst.msk [vmem:[#allocation3 + $0x20] sm:$0xff] %vm428_vm4, %v2705_v59 }
 0x3d8   :  { %2376 = vmatmul.mubr.msk.bf16.vlgmr.msra.gmra.mrb[20].mxu1 %vm470_vm5, %v666_v60 }
 0x3d9   :  { %2392 = vmatpush3.bf16.msra.mxu1 %v2883_v26  ;;  %2399 = vmatprep.mubr.msk.bf16.mxu1 %vm2747_vm2, %v2746_v23 }
 0x3da   :  { %2393 = vmatprep.subr.bf16.mxu1 %v2746_v23 }
 0x3dd   :  { %2394 = vmatpush3.bf16.msra.mxu1 %v2892_v28 }
 0x3de   :  { %2395 = vmatprep.subr.bf16.mxu1 %v2746_v23 }
 0x3e1   :  { %2396 = vmatpush3.bf16.msra.mxu1 %v2901_v30 }
 0x3e2   :  { %2397 = vmatprep.subr.bf16.mxu1 %v2746_v23 }
 0x3e5   :  { %2398 = vmatpush3.bf16.msra.mxu1 %v2917_v32 }
 0x3e6   :  { %2415 = vmatprep.subr.bf16.mxu1 %v2682_v17 }
 0x4ab   :  { %v704_v62 = vpop.f32.mrb[20].mxu1 }
 0x4ac   :  { %v710_v63 = vadd.f32 %v704_v62, %v665_v61  ;;  %v2377_v0 = vpop.f32.mrb[21].mxu1 }
 0x4ad   :  { %v707_v1 = vpop.f32.mrb[22].mxu1 }
 0x4ae   :  { %2706 = vtanh.f32 %v710_v63  ;;  %v2378_v2 = vpop.f32.mrb[23].mxu1 }
 0x4b8   :  { %v2707_v3 = vpop.eup %2706 }
 0x4b9   :  { %712 = vst.msk [vmem:[#allocation3 + $0x20] sm:$0xff] %vm419_vm3, %v2707_v3  ;;  %v715_v4 = vpack.c.bf16 %v2707_v3, %v2707_v3 }
 0x4ba   :  { %713 = vst.msk [vmem:[#allocation3 + $0x18] sm:$0xff] %vm428_vm4, %v2707_v3 }
 0x4bb   :  { %2388 = vmatmul.mubr.msk.bf16.vlgmr.msra.gmra.mrb[20].mxu0 %vm470_vm5, %v715_v4 }
 0x4bc   :  { %2404 = vmatpush3.bf16.msra.mxu0 %v2883_v26  ;;  %2411 = vmatprep.mubr.msk.bf16.mxu0 %vm2747_vm2, %v2746_v23 }
 0x4bd   :  { %2405 = vmatprep.subr.bf16.mxu0 %v2746_v23 }
 0x4c0   :  { %2406 = vmatpush3.bf16.msra.mxu0 %v2892_v28  ;;  %v865_v45 = vld [vmem:[#allocation3 + $0x20] sm:$0xff] }
 0x4c1   :  { %2407 = vmatprep.subr.bf16.mxu0 %v2746_v23  ;;  %v864_v43 = vld [vmem:[#allocation3 + $0x18] sm:$0xff] }
 0x4c4   :  { %2408 = vmatpush3.bf16.msra.mxu0 %v2901_v30  ;;  %v763_v30 = vld [vmem:[#allocation2 + $0x30] sm:$0xff] }
 0x4c5   :  { %2409 = vmatprep.subr.bf16.mxu0 %v2746_v23 }
 0x4c8   :  { %2410 = vmatpush3.bf16.msra.mxu0 %v2917_v32 }
 0x4c9   :  { %2431 = vmatprep.subr.bf16.mxu0 %v2746_v23 }
 0x58e   :  { %v753_v6 = vpop.f32.mrb[20].mxu0 }
 0x58f   :  { %v759_v26 = vadd.f32 %v753_v6, %v714_v5  ;;  %v2389_v7 = vpop.f32.mrb[21].mxu0 }
 0x590   :  { %v756_v8 = vpop.f32.mrb[22].mxu0 }
 0x591   :  { %2708 = vtanh.f32 %v759_v26  ;;  %v2390_v9 = vpop.f32.mrb[23].mxu0 }
 0x59b   :  { %v2709_v10 = vpop.eup %2708 }
 0x59c   :  { %761 = vst.msk [vmem:[#allocation3 + $0x28] sm:$0xff] %vm419_vm3, %v2709_v10  ;;  %v764_v28 = vpack.c.bf16 %v2709_v10, %v2709_v10 }
 0x59d   :  { %762 = vst.msk [vmem:[#allocation3 + $0x10] sm:$0xff] %vm428_vm4, %v2709_v10 }
 0x59e   :  { %2400 = vmatmul.mubr.msk.bf16.vlgmr.msra.gmra.mrb[24].mxu1 %vm470_vm5, %v764_v28 }
 0x59f   :  { %2416 = vmatpush3.bf16.msra.mxu1 %v2682_v17 }
 0x5a0   :  { %2417 = vmatprep.subr.bf16.mxu1 %v2683_v18 }
 0x5a3   :  { %2418 = vmatpush3.bf16.msra.mxu1 %v2683_v18  ;;  %v866_v41 = vld [vmem:[#allocation3 + $0x28] sm:$0xff] }
 0x5a4   :  { %2419 = vmatprep.subr.bf16.mxu1 %v2684_v19  ;;  %v863_v38 = vld [vmem:[#allocation3 + $0x10] sm:$0xff]  ;;  %v871_v46 = vpack.c.bf16 %v866_v41, %v865_v45 }
 0x5a5   :  { %v870_v44 = vpack.c.bf16 %v864_v43, %v863_v38 }
 0x5a7   :  { %2420 = vmatpush3.bf16.msra.mxu1 %v2684_v19 }
 0x5a8   :  { %2421 = vmatprep.subr.bf16.mxu1 %v2685_v20 }
 0x5ab   :  { %2422 = vmatpush3.bf16.msra.mxu1 %v2685_v20 }
 0x5ac   :  { %2443 = vmatprep.subr.bf16.mxu1 %v2746_v23 }
 0x671   :  { %v802_v11 = vpop.f32.mrb[24].mxu1 }
 0x672   :  { %v808_v32 = vadd.f32 %v802_v11, %v763_v30  ;;  %v2401_v12 = vpop.f32.mrb[25].mxu1 }
 0x673   :  { %v805_v13 = vpop.f32.mrb[26].mxu1 }
 0x674   :  { %2710 = vtanh.f32 %v808_v32  ;;  %v2402_v14 = vpop.f32.mrb[27].mxu1 }
 0x67e   :  { %v2711_v15 = vpop.eup %2710 }
 0x67f   :  { %810 = vst.msk [vmem:[#allocation3 + $0x30] sm:$0xff] %vm419_vm3, %v2711_v15  ;;  %v813_v16 = vpack.c.bf16 %v2711_v15, %v2711_v15 }
 0x680   :  { %811 = vst.msk [vmem:[#allocation3 + $0x8] sm:$0xff] %vm428_vm4, %v2711_v15 }
 0x681   :  { %2412 = vmatmul.mubr.msk.bf16.vlgmr.msra.gmra.mrb[24].mxu0 %vm470_vm5, %v813_v16 }
 0x682   :  { %2439 = vmatprep.mubr.msk.bf16.mxu0 %vm2747_vm2, %v2746_v23  ;;  %2432 = vmatpush3.bf16.msra.mxu0 %v3061_v21 }
 0x683   :  { %2433 = vmatprep.subr.bf16.mxu0 %v2746_v23 }
 0x686   :  { %2434 = vmatpush3.bf16.msra.mxu0 %v3067_v22  ;;  %v867_v48 = vld [vmem:[#allocation3 + $0x30] sm:$0xff] }
 0x687   :  { %2435 = vmatprep.subr.bf16.mxu0 %v2746_v23  ;;  %v862_v40 = vld [vmem:[#allocation3 + $0x8] sm:$0xff] }
 0x68a   :  { %2436 = vmatpush3.bf16.msra.mxu0 %v3075_v24 }
 0x68b   :  { %2437 = vmatprep.subr.bf16.mxu0 %v2746_v23 }
 0x68e   :  { %2438 = vmatpush3.bf16.msra.mxu0 %v3081_v25 }
 0x68f   :  { %2455 = vmatprep.subr.bf16.mxu0 %v2746_v23 }
 0x691   :  { %2440 = vmatmul.mubr.bf16.vlgmr.msra.gmra.mrb[28].mxu0 %v2748_v34 }
 0x692   :  { %2456 = vmatpush3.bf16.msra.mxu0 %v3061_v21  ;;  %2463 = vmatprep.mubr.msk.bf16.mxu0 %vm2747_vm2, %v2746_v23 }
 0x693   :  { %2457 = vmatprep.subr.bf16.mxu0 %v2746_v23 }
 0x696   :  { %2458 = vmatpush3.bf16.msra.mxu0 %v3067_v22 }
 0x697   :  { %2459 = vmatprep.subr.bf16.mxu0 %v2746_v23 }
 0x69a   :  { %2460 = vmatpush3.bf16.msra.mxu0 %v3075_v24 }
 0x69b   :  { %2461 = vmatprep.subr.bf16.mxu0 %v2746_v23 }
 0x69e   :  { %2462 = vmatpush3.bf16.msra.mxu0 %v3081_v25 }
 0x69f   :  { %2479 = vmatprep.subr.bf16.mxu0 %v2746_v23 }
 0x754   :  { %v851_v29 = vpop.f32.mrb[24].mxu0 }
 0x755   :  { %v857_v31 = vadd.f32 %v851_v29, %v812_v27  ;;  %v2413_v33 = vpop.f32.mrb[25].mxu0 }
 0x756   :  { %v854_v35 = vpop.f32.mrb[26].mxu0 }
 0x757   :  { %2712 = vtanh.f32 %v857_v31  ;;  %v2414_v36 = vpop.f32.mrb[27].mxu0 }
 0x761   :  { %v2713_v37 = vpop.eup %2712 }
 0x762   :  { %859 = vst.msk [vmem:[#allocation3 + $0x38] sm:$0xff] %vm419_vm3, %v2713_v37 }
 0x763   :  { %860 = vst.msk [vmem:[#allocation3] sm:$0xff] %vm428_vm4, %v2713_v37 }
 0x764   :  { %v1073_v50 = vpop.f32.mrb[28].mxu0 }
 0x765   :  { %v2441_v51 = vpop.f32.mrb[29].mxu0 }
 0x766   :  { %v1076_v52 = vpop.f32.mrb[30].mxu0 }
 0x767   :  { %v2442_v53 = vpop.f32.mrb[31].mxu0 }
 0x769   :  { %v868_v47 = vld [vmem:[#allocation3 + $0x38] sm:$0xff] }
 0x76a   :  { %v861_v39 = vld [vmem:[#allocation3] sm:$0xff]  ;;  %v872_v49 = vpack.c.bf16 %v868_v47, %v867_v48 }
 0x76b   :  { %v869_v42 = vpack.c.bf16 %v862_v40, %v861_v39 }
 0x76d   :  { %2423 = vmatprep.mubr.msk.bf16.mxu1 %vm470_vm5, %v869_v42 }
 0x76e   :  { %2424 = vmatmul.mubr.msk.bf16.vlgmr.msra.gmra.mrb[28].mxu1 %vm470_vm5, %v870_v44 }
 0x76f   :  { %2427 = vmatprep.mubr.msk.bf16.mxu1 %vm470_vm5, %v871_v46  ;;  %2444 = vmatpush3.bf16.msra.mxu1 %v3061_v21 }
 0x770   :  { %2445 = vmatprep.subr.bf16.mxu1 %v2746_v23 }
 0x773   :  { %2446 = vmatpush3.bf16.msra.mxu1 %v3067_v22 }
 0x774   :  { %2447 = vmatprep.subr.bf16.mxu1 %v2746_v23 }
 0x776   :  { %2428 = vmatmul.mubr.msk.bf16.gmra.mrb[32].mxu1 %vm470_vm5, %v872_v49 }
 0x777   :  { %2448 = vmatpush3.bf16.msra.mxu1 %v3075_v24  ;;  %2451 = vmatprep.mubr.msk.bf16.mxu1 %vm2747_vm2, %v2746_v23 }
 0x778   :  { %2449 = vmatprep.subr.bf16.mxu1 %v2746_v23 }
 0x77b   :  { %2450 = vmatpush3.bf16.msra.mxu1 %v3081_v25 }
 0x77c   :  { %2467 = vmatprep.subr.bf16.mxu1 %v2746_v23 }
 0x841   :  { %v2425_v55 = vpop.f32.mrb[28].mxu1 }
 0x842   :  { %v967_v56 = vadd.f32 %v2425_v55, %v2064_v54  ;;  %v958_v57 = vpop.f32.mrb[29].mxu1 }
 0x843   :  { %v959_v58 = vadd.f32 %v2064_v54, %v958_v57  ;;  %v2426_v59 = vpop.f32.mrb[30].mxu1 }
 0x844   :  { %991 = vst.msk [vmem:[#allocation2 + $0x10] sm:$0xff] %vm419_vm3, %v967_v56  ;;  %v970_v60 = vadd.f32 %v2426_v59, %v2064_v54  ;;  %v961_v61 = vpop.f32.mrb[31].mxu1 }
 0x845   :  { %989 = vst.msk [vmem:[#allocation2] sm:$0xff] %vm419_vm3, %v959_v58  ;;  %v962_v62 = vadd.f32 %v2064_v54, %v961_v61  ;;  %v2690_v61 = vld [vmem:[%s3378_s5] sm:$0xff]  }
 0x846   :  { %992 = vst.msk [vmem:[#allocation2 + $0x18] sm:$0xff] %vm419_vm3, %v970_v60 }
 0x847   :  { %990 = vst.msk [vmem:[#allocation2 + $0x8] sm:$0xff] %vm419_vm3, %v962_v62 }
 0x849   :  { %v2429_v63 = vpop.f32.mrb[32].mxu1 }
 0x84a   :  { %v983_v0 = vadd.f32 %v2429_v63, %v2064_v54  ;;  %v974_v1 = vpop.f32.mrb[33].mxu1  ;;  %v2692_v63 = vld [vmem:[%s3378_s5 + $0x10] sm:$0xff]  }
 0x84b   :  { %v975_v2 = vadd.f32 %v2064_v54, %v974_v1  ;;  %v2430_v3 = vpop.f32.mrb[34].mxu1  ;;  %v3220_v1 = vld [vmem:[%s3374_s7 + $0x40] sm:$0xff]  }
 0x84c   :  { %995 = vst.msk [vmem:[#allocation2 + $0x30] sm:$0xff] %vm419_vm3, %v983_v0  ;;  %v986_v4 = vadd.f32 %v2430_v3, %v2064_v54  ;;  %v977_v5 = vpop.f32.mrb[35].mxu1  ;;  %v3234_v3 = vld [vmem:[%s3374_s7 + $0x50] sm:$0xff]  }
 0x84d   :  { %998 = vst.msk [vmem:[#allocation2 + $0x8] sm:$0xff] %vm428_vm4, %v983_v0  ;;  %1003 = vst.msk [vmem:[#allocation2 + $0x30] sm:$0xff] %vm428_vm4, %v962_v62  ;;  %v978_v6 = vadd.f32 %v2064_v54, %v977_v5  ;;  %v2691_v62 = vld [vmem:[%s3378_s5 + $0x8] sm:$0xff]   ;;  %v2693_v0 = vld [vmem:[%s3378_s5 + $0x18] sm:$0xff]  }
 0x84e   :  { %993 = vst.msk [vmem:[#allocation2 + $0x20] sm:$0xff] %vm419_vm3, %v975_v2  ;;  %996 = vst.msk [vmem:[#allocation2 + $0x38] sm:$0xff] %vm419_vm3, %v986_v4 }
 0x84f   :  { %1000 = vst.msk [vmem:[#allocation2 + $0x18] sm:$0xff] %vm428_vm4, %v975_v2  ;;  %1001 = vst.msk [vmem:[#allocation2 + $0x20] sm:$0xff] %vm428_vm4, %v970_v60  ;;  %v3226_v2 = vld [vmem:[%s3374_s7 + $0x48] sm:$0xff]  }
 0x850   :  { %997 = vst.msk [vmem:[#allocation2] sm:$0xff] %vm428_vm4, %v986_v4  ;;  %1004 = vst.msk [vmem:[#allocation2 + $0x38] sm:$0xff] %vm428_vm4, %v959_v58  ;;  %v3240_v4 = vld [vmem:[%s3374_s7 + $0x58] sm:$0xff]  }
 0x851   :  { %994 = vst.msk [vmem:[#allocation2 + $0x28] sm:$0xff] %vm419_vm3, %v978_v6 }
 0x852   :  { %999 = vst.msk [vmem:[#allocation2 + $0x10] sm:$0xff] %vm428_vm4, %v978_v6  ;;  %1002 = vst.msk [vmem:[#allocation2 + $0x28] sm:$0xff] %vm428_vm4, %v967_v56 }
 0x854   :  { %v1083_v10 = vld [vmem:[#allocation2 + $0x8] sm:$0xff] }
 0x856   :  { %v1181_v31 = vld [vmem:[#allocation2 + $0x18] sm:$0xff]  ;;  %v1230_v41 = vld [vmem:[#allocation2 + $0x20] sm:$0xff] }
 0x857   :  { %v1014_v26 = vld [vmem:[#allocation2] sm:$0xff] }
 0x858   :  { %v1079_v7 = vadd.f32 %v1073_v50, %v1014_v26 }
 0x859   :  { %v1132_v15 = vld [vmem:[#allocation2 + $0x10] sm:$0xff]  ;;  %v1279_v49 = vld [vmem:[#allocation2 + $0x28] sm:$0xff] }
 0x85a   :  { %2714 = vtanh.f32 %v1079_v7 }
 0x864   :  { %v2715_v8 = vpop.eup %2714 }
 0x865   :  { %1081 = vst.msk [vmem:[#allocation3] sm:$0xff] %vm419_vm3, %v2715_v8  ;;  %v1084_v9 = vpack.c.bf16 %v2715_v8, %v2715_v8 }
 0x866   :  { %1082 = vst.msk [vmem:[#allocation3 + $0x38] sm:$0xff] %vm428_vm4, %v2715_v8 }
 0x867   :  { %2452 = vmatmul.mubr.msk.bf16.vlgmr.msra.gmra.mrb[36].mxu1 %vm470_vm5, %v1084_v9 }
 0x868   :  { %2468 = vmatpush3.bf16.msra.mxu1 %v3061_v21  ;;  %2475 = vmatprep.mubr.msk.bf16.mxu1 %vm2747_vm2, %v2746_v23 }
 0x869   :  { %2469 = vmatprep.subr.bf16.mxu1 %v2746_v23 }
 0x86c   :  { %2470 = vmatpush3.bf16.msra.mxu1 %v3067_v22 }
 0x86d   :  { %2471 = vmatprep.subr.bf16.mxu1 %v2746_v23 }
 0x870   :  { %2472 = vmatpush3.bf16.msra.mxu1 %v3075_v24 }
 0x871   :  { %2473 = vmatprep.subr.bf16.mxu1 %v2746_v23 }
 0x874   :  { %2474 = vmatpush3.bf16.msra.mxu1 %v3081_v25 }
 0x875   :  { %2491 = vmatprep.subr.bf16.mxu1 %v2746_v23 }
 0x93a   :  { %v1122_v28 = vpop.f32.mrb[36].mxu1 }
 0x93b   :  { %v1128_v30 = vadd.f32 %v1122_v28, %v1083_v10  ;;  %v2453_v11 = vpop.f32.mrb[37].mxu1 }
 0x93c   :  { %v1125_v32 = vpop.f32.mrb[38].mxu1 }
 0x93d   :  { %2716 = vtanh.f32 %v1128_v30  ;;  %v2454_v12 = vpop.f32.mrb[39].mxu1 }
 0x947   :  { %v2717_v13 = vpop.eup %2716 }
 0x948   :  { %1130 = vst.msk [vmem:[#allocation3 + $0x8] sm:$0xff] %vm419_vm3, %v2717_v13  ;;  %v1133_v14 = vpack.c.bf16 %v2717_v13, %v2717_v13 }
 0x949   :  { %1131 = vst.msk [vmem:[#allocation3 + $0x30] sm:$0xff] %vm428_vm4, %v2717_v13 }
 0x94a   :  { %2464 = vmatmul.mubr.msk.bf16.vlgmr.msra.gmra.mrb[32].mxu0 %vm470_vm5, %v1133_v14 }
 0x94b   :  { %2480 = vmatpush3.bf16.msra.mxu0 %v3061_v21  ;;  %2487 = vmatprep.mubr.msk.bf16.mxu0 %vm2747_vm2, %v2746_v23 }
 0x94c   :  { %2481 = vmatprep.subr.bf16.mxu0 %v2746_v23 }
 0x94f   :  { %2482 = vmatpush3.bf16.msra.mxu0 %v3067_v22 }
 0x950   :  { %2483 = vmatprep.subr.bf16.mxu0 %v2746_v23 }
 0x953   :  { %2484 = vmatpush3.bf16.msra.mxu0 %v3075_v24 }
 0x954   :  { %2485 = vmatprep.subr.bf16.mxu0 %v2746_v23 }
 0x957   :  { %2486 = vmatpush3.bf16.msra.mxu0 %v3081_v25 }
 0x958   :  { %2503 = vmatprep.subr.bf16.mxu0 %v2746_v23 }
 0xa1d   :  { %v1171_v16 = vpop.f32.mrb[32].mxu0 }
 0xa1e   :  { %v1177_v17 = vadd.f32 %v1171_v16, %v1132_v15  ;;  %v2465_v18 = vpop.f32.mrb[33].mxu0 }
 0xa1f   :  { %v1174_v19 = vpop.f32.mrb[34].mxu0 }
 0xa20   :  { %2718 = vtanh.f32 %v1177_v17  ;;  %v2466_v20 = vpop.f32.mrb[35].mxu0 }
 0xa2a   :  { %v2719_v27 = vpop.eup %2718 }
 0xa2b   :  { %1179 = vst.msk [vmem:[#allocation3 + $0x10] sm:$0xff] %vm419_vm3, %v2719_v27  ;;  %v1182_v29 = vpack.c.bf16 %v2719_v27, %v2719_v27 }
 0xa2c   :  { %1180 = vst.msk [vmem:[#allocation3 + $0x28] sm:$0xff] %vm428_vm4, %v2719_v27 }
 0xa2d   :  { %2476 = vmatmul.mubr.msk.bf16.vlgmr.msra.gmra.mrb[40].mxu1 %vm470_vm5, %v1182_v29 }
 0xa2e   :  { %2492 = vmatpush3.bf16.msra.mxu1 %v3061_v21  ;;  %2499 = vmatprep.mubr.msk.bf16.mxu1 %vm2747_vm2, %v2746_v23 }
 0xa2f   :  { %2493 = vmatprep.subr.bf16.mxu1 %v2746_v23 }
 0xa32   :  { %2494 = vmatpush3.bf16.msra.mxu1 %v3067_v22 }
 0xa33   :  { %2495 = vmatprep.subr.bf16.mxu1 %v2746_v23 }
 0xa36   :  { %2496 = vmatpush3.bf16.msra.mxu1 %v3075_v24 }
 0xa37   :  { %2497 = vmatprep.subr.bf16.mxu1 %v2746_v23 }
 0xa3a   :  { %2498 = vmatpush3.bf16.msra.mxu1 %v3081_v25 }
 0xa3b   :  { %2515 = vmatprep.subr.bf16.mxu1 %v2746_v23 }
 0xb00   :  { %v1220_v33 = vpop.f32.mrb[40].mxu1 }
 0xb01   :  { %v1226_v35 = vadd.f32 %v1220_v33, %v1181_v31  ;;  %v2477_v36 = vpop.f32.mrb[41].mxu1  ;;  %v2092_v31 = vld [vmem:[%s3379_s6] ss:$0 sm:$0xff] }
 0xb02   :  { %v1223_v37 = vpop.f32.mrb[42].mxu1 }
 0xb03   :  { %2720 = vtanh.f32 %v1226_v35  ;;  %v2478_v38 = vpop.f32.mrb[43].mxu1 }
 0xb0d   :  { %v2721_v39 = vpop.eup %2720 }
 0xb0e   :  { %1228 = vst.msk [vmem:[#allocation3 + $0x18] sm:$0xff] %vm419_vm3, %v2721_v39  ;;  %v1231_v40 = vpack.c.bf16 %v2721_v39, %v2721_v39 }
 0xb0f   :  { %1229 = vst.msk [vmem:[#allocation3 + $0x20] sm:$0xff] %vm428_vm4, %v2721_v39 }
 0xb10   :  { %2488 = vmatmul.mubr.msk.bf16.vlgmr.msra.gmra.mrb[36].mxu0 %vm470_vm5, %v1231_v40 }
 0xb11   :  { %2504 = vmatpush3.bf16.msra.mxu0 %v3061_v21  ;;  %2511 = vmatprep.mubr.msk.bf16.mxu0 %vm2747_vm2, %v2746_v23 }
 0xb12   :  { %2505 = vmatprep.subr.bf16.mxu0 %v2746_v23 }
 0xb15   :  { %2506 = vmatpush3.bf16.msra.mxu0 %v3067_v22 }
 0xb16   :  { %2507 = vmatprep.subr.bf16.mxu0 %v2746_v23 }
 0xb19   :  { %2508 = vmatpush3.bf16.msra.mxu0 %v3075_v24 }
 0xb1a   :  { %2509 = vmatprep.subr.bf16.mxu0 %v2746_v23 }
 0xb1d   :  { %2510 = vmatpush3.bf16.msra.mxu0 %v3081_v25 }
 0xb1e   :  { %2527 = vmatprep.subr.bf16.mxu0 %v2690_v61 }
 0xbe3   :  { %v1269_v42 = vpop.f32.mrb[36].mxu0 }
 0xbe4   :  { %v1275_v43 = vadd.f32 %v1269_v42, %v1230_v41  ;;  %v2489_v44 = vpop.f32.mrb[37].mxu0 }
 0xbe5   :  { %v1272_v45 = vpop.f32.mrb[38].mxu0 }
 0xbe6   :  { %2722 = vtanh.f32 %v1275_v43  ;;  %v2490_v46 = vpop.f32.mrb[39].mxu0 }
 0xbf0   :  { %v2723_v47 = vpop.eup %2722 }
 0xbf1   :  { %1277 = vst.msk [vmem:[#allocation3 + $0x20] sm:$0xff] %vm419_vm3, %v2723_v47  ;;  %v1280_v48 = vpack.c.bf16 %v2723_v47, %v2723_v47 }
 0xbf2   :  { %1278 = vst.msk [vmem:[#allocation3 + $0x18] sm:$0xff] %vm428_vm4, %v2723_v47 }
 0xbf3   :  { %2500 = vmatmul.mubr.msk.bf16.vlgmr.msra.gmra.mrb[44].mxu1 %vm470_vm5, %v1280_v48 }
 0xbf4   :  { %2516 = vmatpush3.bf16.msra.mxu1 %v3061_v21  ;;  %2523 = vmatprep.mubr.msk.bf16.mxu1 %vm2747_vm2, %v2746_v23 }
 0xbf5   :  { %2517 = vmatprep.subr.bf16.mxu1 %v2746_v23 }
 0xbf8   :  { %2518 = vmatpush3.bf16.msra.mxu1 %v3067_v22  ;;  %v1430_v14 = vld [vmem:[#allocation3 + $0x20] sm:$0xff] }
 0xbf9   :  { %2519 = vmatprep.subr.bf16.mxu1 %v2746_v23  ;;  %v1429_v12 = vld [vmem:[#allocation3 + $0x18] sm:$0xff] }
 0xbfc   :  { %2520 = vmatpush3.bf16.msra.mxu1 %v3075_v24  ;;  %v1328_v24 = vld [vmem:[#allocation2 + $0x30] sm:$0xff] }
 0xbfd   :  { %2521 = vmatprep.subr.bf16.mxu1 %v2746_v23 }
 0xc00   :  { %2522 = vmatpush3.bf16.msra.mxu1 %v3081_v25 }
 0xc01   :  { %2543 = vmatprep.subr.bf16.mxu1 %v2746_v23 }
 0xcc6   :  { %v1318_v50 = vpop.f32.mrb[44].mxu1 }
 0xcc7   :  { %v1324_v21 = vadd.f32 %v1318_v50, %v1279_v49  ;;  %v2501_v51 = vpop.f32.mrb[45].mxu1 }
 0xcc8   :  { %v1321_v52 = vpop.f32.mrb[46].mxu1 }
 0xcc9   :  { %2724 = vtanh.f32 %v1324_v21  ;;  %v2502_v53 = vpop.f32.mrb[47].mxu1 }
 0xcd3   :  { %v2725_v54 = vpop.eup %2724 }
 0xcd4   :  { %1326 = vst.msk [vmem:[#allocation3 + $0x28] sm:$0xff] %vm419_vm3, %v2725_v54  ;;  %v1329_v22 = vpack.c.bf16 %v2725_v54, %v2725_v54 }
 0xcd5   :  { %1327 = vst.msk [vmem:[#allocation3 + $0x10] sm:$0xff] %vm428_vm4, %v2725_v54 }
 0xcd6   :  { %2512 = vmatmul.mubr.msk.bf16.vlgmr.msra.gmra.mrb[40].mxu0 %vm470_vm5, %v1329_v22 }
 0xcd7   :  { %2528 = vmatpush3.bf16.msra.mxu0 %v2690_v61 }
 0xcd8   :  { %2529 = vmatprep.subr.bf16.mxu0 %v2691_v62 }
 0xcdb   :  { %2530 = vmatpush3.bf16.msra.mxu0 %v2691_v62  ;;  %v1431_v11 = vld [vmem:[#allocation3 + $0x28] sm:$0xff] }
 0xcdc   :  { %2531 = vmatprep.subr.bf16.mxu0 %v2692_v63  ;;  %v1428_v10 = vld [vmem:[#allocation3 + $0x10] sm:$0xff]  ;;  %v1436_v15 = vpack.c.bf16 %v1431_v11, %v1430_v14 }
 0xcdd   :  { %v1435_v13 = vpack.c.bf16 %v1429_v12, %v1428_v10 }
 0xcdf   :  { %2532 = vmatpush3.bf16.msra.mxu0 %v2692_v63 }
 0xce0   :  { %2533 = vmatprep.subr.bf16.mxu0 %v2693_v0 }
 0xce3   :  { %2534 = vmatpush3.bf16.msra.mxu0 %v2693_v0 }
 0xce4   :  { %2555 = vmatprep.subr.bf16.mxu0 %v2746_v23 }
 0xda9   :  { %v1367_v55 = vpop.f32.mrb[40].mxu0 }
 0xdaa   :  { %v1373_v25 = vadd.f32 %v1367_v55, %v1328_v24  ;;  %v2513_v56 = vpop.f32.mrb[41].mxu0 }
 0xdab   :  { %v1370_v57 = vpop.f32.mrb[42].mxu0 }
 0xdac   :  { %2726 = vtanh.f32 %v1373_v25  ;;  %v2514_v58 = vpop.f32.mrb[43].mxu0 }
 0xdb6   :  { %v2727_v59 = vpop.eup %2726 }
 0xdb7   :  { %1375 = vst.msk [vmem:[#allocation3 + $0x30] sm:$0xff] %vm419_vm3, %v2727_v59  ;;  %v1378_v60 = vpack.c.bf16 %v2727_v59, %v2727_v59 }
 0xdb8   :  { %1376 = vst.msk [vmem:[#allocation3 + $0x8] sm:$0xff] %vm428_vm4, %v2727_v59 }
 0xdb9   :  { %2524 = vmatmul.mubr.msk.bf16.vlgmr.msra.gmra.mrb[48].mxu1 %vm470_vm5, %v1378_v60 }
 0xdba   :  { %2551 = vmatprep.mubr.msk.bf16.mxu1 %vm2747_vm2, %v2746_v23  ;;  %2544 = vmatpush3.bf16.msra.mxu1 %v3220_v1 }
 0xdbb   :  { %2545 = vmatprep.subr.bf16.mxu1 %v2746_v23 }
 0xdbe   :  { %2546 = vmatpush3.bf16.msra.mxu1 %v3226_v2  ;;  %v1432_v17 = vld [vmem:[#allocation3 + $0x30] sm:$0xff] }
 0xdbf   :  { %2547 = vmatprep.subr.bf16.mxu1 %v2746_v23  ;;  %v1427_v30 = vld [vmem:[#allocation3 + $0x8] sm:$0xff] }
 0xdc2   :  { %2548 = vmatpush3.bf16.msra.mxu1 %v3234_v3 }
 0xdc3   :  { %2549 = vmatprep.subr.bf16.mxu1 %v2746_v23 }
 0xdc6   :  { %2550 = vmatpush3.bf16.msra.mxu1 %v3240_v4 }
 0xdc7   :  { %2567 = vmatprep.subr.bf16.mxu1 %v2746_v23 }
 0xdc9   :  { %2552 = vmatmul.mubr.bf16.vlgmr.msra.gmra.mrb[52].mxu1 %v2748_v34  ;;  %v1377_v34 = vld [vmem:[#allocation2 + $0x38] sm:$0xff] }
 0xdca   :  { %2568 = vmatpush3.bf16.msra.mxu1 %v3220_v1  ;;  %2575 = vmatprep.mubr.msk.bf16.mxu1 %vm2747_vm2, %v2746_v23 }
 0xdcb   :  { %2569 = vmatprep.subr.bf16.mxu1 %v2746_v23 }
 0xdce   :  { %2570 = vmatpush3.bf16.msra.mxu1 %v3226_v2 }
 0xdcf   :  { %2571 = vmatprep.subr.bf16.mxu1 %v2746_v23 }
 0xdd2   :  { %2572 = vmatpush3.bf16.msra.mxu1 %v3234_v3 }
 0xdd3   :  { %2573 = vmatprep.subr.bf16.mxu1 %v2746_v23 }
 0xdd6   :  { %2574 = vmatpush3.bf16.msra.mxu1 %v3240_v4 }
 0xdd7   :  { %2591 = vmatprep.subr.bf16.mxu1 %v2746_v23 }
 0xe8c   :  { %v1416_v5 = vpop.f32.mrb[48].mxu1 }
 0xe8d   :  { %v1422_v6 = vadd.f32 %v1416_v5, %v1377_v34  ;;  %v2525_v26 = vpop.f32.mrb[49].mxu1 }
 0xe8e   :  { %v1419_v7 = vpop.f32.mrb[50].mxu1 }
 0xe8f   :  { %2728 = vtanh.f32 %v1422_v6  ;;  %v2526_v8 = vpop.f32.mrb[51].mxu1 }
 0xe99   :  { %v2729_v9 = vpop.eup %2728 }
 0xe9a   :  { %1424 = vst.msk [vmem:[#allocation3 + $0x38] sm:$0xff] %vm419_vm3, %v2729_v9 }
 0xe9b   :  { %1425 = vst.msk [vmem:[#allocation3] sm:$0xff] %vm428_vm4, %v2729_v9 }
 0xe9c   :  { %v1638_v19 = vpop.f32.mrb[52].mxu1 }
 0xe9d   :  { %v2553_v20 = vpop.f32.mrb[53].mxu1 }
 0xe9e   :  { %v1641_v27 = vpop.f32.mrb[54].mxu1 }
 0xe9f   :  { %v2554_v29 = vpop.f32.mrb[55].mxu1 }
 0xea1   :  { %v1433_v16 = vld [vmem:[#allocation3 + $0x38] sm:$0xff] }
 0xea2   :  { %v1426_v28 = vld [vmem:[#allocation3] sm:$0xff]  ;;  %v1437_v18 = vpack.c.bf16 %v1433_v16, %v1432_v17 }
 0xea3   :  { %v1434_v32 = vpack.c.bf16 %v1427_v30, %v1426_v28 }
 0xea5   :  { %2535 = vmatprep.mubr.msk.bf16.mxu0 %vm470_vm5, %v1434_v32 }
 0xea6   :  { %2536 = vmatmul.mubr.msk.bf16.vlgmr.msra.gmra.mrb[44].mxu0 %vm470_vm5, %v1435_v13 }
 0xea7   :  { %2539 = vmatprep.mubr.msk.bf16.mxu0 %vm470_vm5, %v1436_v15  ;;  %2556 = vmatpush3.bf16.msra.mxu0 %v3220_v1 }
 0xea8   :  { %2557 = vmatprep.subr.bf16.mxu0 %v2746_v23 }
 0xeab   :  { %2558 = vmatpush3.bf16.msra.mxu0 %v3226_v2 }
 0xeac   :  { %2559 = vmatprep.subr.bf16.mxu0 %v2746_v23 }
 0xeae   :  { %2540 = vmatmul.mubr.msk.bf16.gmra.mrb[48].mxu0 %vm470_vm5, %v1437_v18 }
 0xeaf   :  { %2560 = vmatpush3.bf16.msra.mxu0 %v3234_v3  ;;  %2563 = vmatprep.mubr.msk.bf16.mxu0 %vm2747_vm2, %v2746_v23 }
 0xeb0   :  { %2561 = vmatprep.subr.bf16.mxu0 %v2746_v23 }
 0xeb3   :  { %2562 = vmatpush3.bf16.msra.mxu0 %v3240_v4 }
 0xeb4   :  { %2579 = vmatprep.subr.bf16.mxu0 %v2746_v23 }
 0xf79   :  { %v2537_v33 = vpop.f32.mrb[44].mxu0 }
 0xf7a   :  { %v1532_v35 = vadd.f32 %v2537_v33, %v2092_v31  ;;  %v1523_v36 = vpop.f32.mrb[45].mxu0 }
 0xf7b   :  { %v1524_v37 = vadd.f32 %v2092_v31, %v1523_v36  ;;  %v2538_v38 = vpop.f32.mrb[46].mxu0 }
 0xf7c   :  { %1556 = vst.msk [vmem:[#allocation2 + $0x10] sm:$0xff] %vm419_vm3, %v1532_v35  ;;  %v1535_v39 = vadd.f32 %v2538_v38, %v2092_v31  ;;  %v1526_v40 = vpop.f32.mrb[47].mxu0  ;;  %v15_v38 = vstv %s3380_s9 }
 0xf7d   :  { %1554 = vst.msk [vmem:[#allocation2] sm:$0xff] %vm419_vm3, %v1524_v37  ;;  %v1527_v41 = vadd.f32 %v2092_v31, %v1526_v40  ;;  %16 = vst [vmem:[#allocation4] sm:$0x1] %v15_v38 }
 0xf7e   :  { %1557 = vst.msk [vmem:[#allocation2 + $0x18] sm:$0xff] %vm419_vm3, %v1535_v39 }
 0xf7f   :  { %1555 = vst.msk [vmem:[#allocation2 + $0x8] sm:$0xff] %vm419_vm3, %v1527_v41 }
 0xf81   :  { %v2541_v42 = vpop.f32.mrb[48].mxu0 }
 0xf82   :  { %v1548_v43 = vadd.f32 %v2541_v42, %v2092_v31  ;;  %v1539_v44 = vpop.f32.mrb[49].mxu0 }
 0xf83   :  { %v1540_v45 = vadd.f32 %v2092_v31, %v1539_v44  ;;  %v2542_v46 = vpop.f32.mrb[50].mxu0 }
 0xf84   :  { %1560 = vst.msk [vmem:[#allocation2 + $0x30] sm:$0xff] %vm419_vm3, %v1548_v43  ;;  %v1551_v47 = vadd.f32 %v2542_v46, %v2092_v31  ;;  %v1542_v48 = vpop.f32.mrb[51].mxu0  ;;  %v2120_v46 = vld [vmem:[%s3381_s8] ss:$0 sm:$0xff] }
 0xf85   :  { %1563 = vst.msk [vmem:[#allocation2 + $0x8] sm:$0xff] %vm428_vm4, %v1548_v43  ;;  %1568 = vst.msk [vmem:[#allocation2 + $0x30] sm:$0xff] %vm428_vm4, %v1527_v41  ;;  %v1543_v49 = vadd.f32 %v2092_v31, %v1542_v48 }
 0xf86   :  { %1558 = vst.msk [vmem:[#allocation2 + $0x20] sm:$0xff] %vm419_vm3, %v1540_v45  ;;  %1561 = vst.msk [vmem:[#allocation2 + $0x38] sm:$0xff] %vm419_vm3, %v1551_v47 }
 0xf87   :  { %1565 = vst.msk [vmem:[#allocation2 + $0x18] sm:$0xff] %vm428_vm4, %v1540_v45  ;;  %1566 = vst.msk [vmem:[#allocation2 + $0x20] sm:$0xff] %vm428_vm4, %v1535_v39 }
 0xf88   :  { %1562 = vst.msk [vmem:[#allocation2] sm:$0xff] %vm428_vm4, %v1551_v47  ;;  %1569 = vst.msk [vmem:[#allocation2 + $0x38] sm:$0xff] %vm428_vm4, %v1524_v37 }
 0xf89   :  { %1559 = vst.msk [vmem:[#allocation2 + $0x28] sm:$0xff] %vm419_vm3, %v1543_v49 }
 0xf8a   :  { %1564 = vst.msk [vmem:[#allocation2 + $0x10] sm:$0xff] %vm428_vm4, %v1543_v49  ;;  %1567 = vst.msk [vmem:[#allocation2 + $0x28] sm:$0xff] %vm428_vm4, %v1532_v35 }
 0xf8c   :  { %v1648_v53 = vld [vmem:[#allocation2 + $0x8] sm:$0xff] }
 0xf8e   :  { %v1746_v5 = vld [vmem:[#allocation2 + $0x18] sm:$0xff]  ;;  %v1795_v30 = vld [vmem:[#allocation2 + $0x20] sm:$0xff] }
 0xf8f   :  { %v1579_v50 = vld [vmem:[#allocation2] sm:$0xff]  ;;  %v1942_v39 = vld [vmem:[#allocation2 + $0x38] sm:$0xff] }
 0xf90   :  { %v1644_v21 = vadd.f32 %v1638_v19, %v1579_v50  ;;  %v2121_v50 = vld [vmem:[#allocation4] ss:$0 sm:$0xff] }
 0xf91   :  { %v1697_v58 = vld [vmem:[#allocation2 + $0x10] sm:$0xff]  ;;  %v1844_v17 = vld [vmem:[#allocation2 + $0x28] sm:$0xff] }
 0xf92   :  { %2730 = vtanh.f32 %v1644_v21 }
 0xf9c   :  { %v2731_v51 = vpop.eup %2730 }
 0xf9d   :  { %1646 = vst.msk [vmem:[#allocation3] sm:$0xff] %vm419_vm3, %v2731_v51  ;;  %v1649_v52 = vpack.c.bf16 %v2731_v51, %v2731_v51 }
 0xf9e   :  { %1647 = vst.msk [vmem:[#allocation3 + $0x38] sm:$0xff] %vm428_vm4, %v2731_v51 }
 0xf9f   :  { %2564 = vmatmul.mubr.msk.bf16.vlgmr.msra.gmra.mrb[52].mxu0 %vm470_vm5, %v1649_v52 }
 0xfa0   :  { %2580 = vmatpush3.bf16.msra.mxu0 %v3220_v1  ;;  %2587 = vmatprep.mubr.msk.bf16.mxu0 %vm2747_vm2, %v2746_v23 }
 0xfa1   :  { %2581 = vmatprep.subr.bf16.mxu0 %v2746_v23 }
 0xfa4   :  { %2582 = vmatpush3.bf16.msra.mxu0 %v3226_v2 }
 0xfa5   :  { %2583 = vmatprep.subr.bf16.mxu0 %v2746_v23 }
 0xfa8   :  { %2584 = vmatpush3.bf16.msra.mxu0 %v3234_v3 }
 0xfa9   :  { %2585 = vmatprep.subr.bf16.mxu0 %v2746_v23 }
 0xfac   :  { %2586 = vmatpush3.bf16.msra.mxu0 %v3240_v4 }
 0xfad   :  { %2603 = vmatprep.subr.bf16.mxu0 %v2746_v23 }
0x1072   :  { %v1687_v54 = vpop.f32.mrb[52].mxu0 }
0x1073   :  { %v1693_v22 = vadd.f32 %v1687_v54, %v1648_v53  ;;  %v2565_v24 = vpop.f32.mrb[53].mxu0 }
0x1074   :  { %v1690_v55 = vpop.f32.mrb[54].mxu0 }
0x1075   :  { %2732 = vtanh.f32 %v1693_v22  ;;  %v2566_v25 = vpop.f32.mrb[55].mxu0 }
0x107f   :  { %v2733_v56 = vpop.eup %2732 }
0x1080   :  { %1695 = vst.msk [vmem:[#allocation3 + $0x8] sm:$0xff] %vm419_vm3, %v2733_v56  ;;  %v1698_v57 = vpack.c.bf16 %v2733_v56, %v2733_v56 }
0x1081   :  { %1696 = vst.msk [vmem:[#allocation3 + $0x30] sm:$0xff] %vm428_vm4, %v2733_v56 }
0x1082   :  { %2576 = vmatmul.mubr.msk.bf16.vlgmr.msra.gmra.mrb[56].mxu1 %vm470_vm5, %v1698_v57 }
0x1083   :  { %2592 = vmatpush3.bf16.msra.mxu1 %v3220_v1  ;;  %2599 = vmatprep.mubr.msk.bf16.mxu1 %vm2747_vm2, %v2746_v23 }
0x1084   :  { %2593 = vmatprep.subr.bf16.mxu1 %v2746_v23 }
0x1087   :  { %2594 = vmatpush3.bf16.msra.mxu1 %v3226_v2 }
0x1088   :  { %2595 = vmatprep.subr.bf16.mxu1 %v2746_v23 }
0x108b   :  { %2596 = vmatpush3.bf16.msra.mxu1 %v3234_v3 }
0x108c   :  { %2597 = vmatprep.subr.bf16.mxu1 %v2746_v23 }
0x108f   :  { %2598 = vmatpush3.bf16.msra.mxu1 %v3240_v4 }
0x1090   :  { %2615 = vmatprep.subr.bf16.mxu1 %v2746_v23 }
0x1155   :  { %v1736_v59 = vpop.f32.mrb[56].mxu1 }
0x1156   :  { %v1742_v60 = vadd.f32 %v1736_v59, %v1697_v58  ;;  %v2577_v61 = vpop.f32.mrb[57].mxu1 }
0x1157   :  { %v1739_v62 = vpop.f32.mrb[58].mxu1 }
0x1158   :  { %2734 = vtanh.f32 %v1742_v60  ;;  %v2578_v63 = vpop.f32.mrb[59].mxu1 }
0x1162   :  { %v2735_v0 = vpop.eup %2734 }
0x1163   :  { %1744 = vst.msk [vmem:[#allocation3 + $0x10] sm:$0xff] %vm419_vm3, %v2735_v0  ;;  %v1747_v34 = vpack.c.bf16 %v2735_v0, %v2735_v0 }
0x1164   :  { %1745 = vst.msk [vmem:[#allocation3 + $0x28] sm:$0xff] %vm428_vm4, %v2735_v0 }
0x1165   :  { %2588 = vmatmul.mubr.msk.bf16.vlgmr.msra.gmra.mrb[56].mxu0 %vm470_vm5, %v1747_v34 }
0x1166   :  { %2604 = vmatpush3.bf16.msra.mxu0 %v3220_v1  ;;  %2611 = vmatprep.mubr.msk.bf16.mxu0 %vm2747_vm2, %v2746_v23 }
0x1167   :  { %2605 = vmatprep.subr.bf16.mxu0 %v2746_v23 }
0x116a   :  { %2606 = vmatpush3.bf16.msra.mxu0 %v3226_v2 }
0x116b   :  { %2607 = vmatprep.subr.bf16.mxu0 %v2746_v23 }
0x116e   :  { %2608 = vmatpush3.bf16.msra.mxu0 %v3234_v3 }
0x116f   :  { %2609 = vmatprep.subr.bf16.mxu0 %v2746_v23 }
0x1172   :  { %2610 = vmatpush3.bf16.msra.mxu0 %v3240_v4 }
0x1173   :  { %2627 = vmatprep.subr.bf16.mxu0 %v2746_v23 }
0x1238   :  { %v1785_v6 = vpop.f32.mrb[56].mxu0 }
0x1239   :  { %v1791_v26 = vadd.f32 %v1785_v6, %v1746_v5  ;;  %v2589_v7 = vpop.f32.mrb[57].mxu0 }
0x123a   :  { %v1788_v8 = vpop.f32.mrb[58].mxu0 }
0x123b   :  { %2736 = vtanh.f32 %v1791_v26  ;;  %v2590_v9 = vpop.f32.mrb[59].mxu0 }
0x1245   :  { %v2737_v10 = vpop.eup %2736 }
0x1246   :  { %1793 = vst.msk [vmem:[#allocation3 + $0x18] sm:$0xff] %vm419_vm3, %v2737_v10  ;;  %v1796_v28 = vpack.c.bf16 %v2737_v10, %v2737_v10 }
0x1247   :  { %1794 = vst.msk [vmem:[#allocation3 + $0x20] sm:$0xff] %vm428_vm4, %v2737_v10 }
0x1248   :  { %2600 = vmatmul.mubr.msk.bf16.vlgmr.msra.gmra.mrb[60].mxu1 %vm470_vm5, %v1796_v28 }
0x1249   :  { %2616 = vmatpush3.bf16.msra.mxu1 %v3220_v1  ;;  %2623 = vmatprep.mubr.msk.bf16.mxu1 %vm2747_vm2, %v2746_v23 }
0x124a   :  { %2617 = vmatprep.subr.bf16.mxu1 %v2746_v23 }
0x124d   :  { %2618 = vmatpush3.bf16.msra.mxu1 %v3226_v2 }
0x124e   :  { %2619 = vmatprep.subr.bf16.mxu1 %v2746_v23 }
0x1251   :  { %2620 = vmatpush3.bf16.msra.mxu1 %v3234_v3 }
0x1252   :  { %2621 = vmatprep.subr.bf16.mxu1 %v2746_v23 }
0x1255   :  { %2622 = vmatpush3.bf16.msra.mxu1 %v3240_v4 }
0x131b   :  { %v1834_v11 = vpop.f32.mrb[60].mxu1 }
0x131c   :  { %v1840_v32 = vadd.f32 %v1834_v11, %v1795_v30  ;;  %v2601_v12 = vpop.f32.mrb[61].mxu1 }
0x131d   :  { %v1837_v13 = vpop.f32.mrb[62].mxu1 }
0x131e   :  { %2738 = vtanh.f32 %v1840_v32  ;;  %v2602_v14 = vpop.f32.mrb[63].mxu1 }
0x1328   :  { %v2739_v15 = vpop.eup %2738 }
0x1329   :  { %1842 = vst.msk [vmem:[#allocation3 + $0x20] sm:$0xff] %vm419_vm3, %v2739_v15  ;;  %v1845_v16 = vpack.c.bf16 %v2739_v15, %v2739_v15 }
0x132a   :  { %1843 = vst.msk [vmem:[#allocation3 + $0x18] sm:$0xff] %vm428_vm4, %v2739_v15 }
0x132b   :  { %2612 = vmatmul.mubr.msk.bf16.vlgmr.msra.gmra.mrb[60].mxu0 %vm470_vm5, %v1845_v16 }
0x132c   :  { %2628 = vmatpush3.bf16.msra.mxu0 %v3220_v1  ;;  %2635 = vmatprep.mubr.msk.bf16.mxu0 %vm2747_vm2, %v2746_v23 }
0x132d   :  { %2629 = vmatprep.subr.bf16.mxu0 %v2746_v23 }
0x1330   :  { %2630 = vmatpush3.bf16.msra.mxu0 %v3226_v2 }
0x1331   :  { %2631 = vmatprep.subr.bf16.mxu0 %v2746_v23 }
0x1334   :  { %2632 = vmatpush3.bf16.msra.mxu0 %v3234_v3  ;;  %v1893_v3 = vld [vmem:[#allocation2 + $0x30] sm:$0xff] }
0x1335   :  { %2633 = vmatprep.subr.bf16.mxu0 %v2746_v23 }
0x1338   :  { %2634 = vmatpush3.bf16.msra.mxu0 %v3240_v4 }
0x13fe   :  { %v1883_v18 = vpop.f32.mrb[60].mxu0 }
0x13ff   :  { %v1889_v19 = vadd.f32 %v1883_v18, %v1844_v17  ;;  %v2613_v20 = vpop.f32.mrb[61].mxu0 }
0x1400   :  { %v1886_v1 = vpop.f32.mrb[62].mxu0 }
0x1401   :  { %2740 = vtanh.f32 %v1889_v19  ;;  %v2614_v27 = vpop.f32.mrb[63].mxu0 }
0x140b   :  { %v2741_v29 = vpop.eup %2740 }
0x140c   :  { %1891 = vst.msk [vmem:[#allocation3 + $0x28] sm:$0xff] %vm419_vm3, %v2741_v29  ;;  %v1894_v2 = vpack.c.bf16 %v2741_v29, %v2741_v29 }
0x140d   :  { %1892 = vst.msk [vmem:[#allocation3 + $0x10] sm:$0xff] %vm428_vm4, %v2741_v29 }
0x140e   :  { %2624 = vmatmul.mubr.msk.bf16.vlgmr.msra.gmra.mrb[64].mxu1 %vm470_vm5, %v1894_v2 }
0x14e1   :  { %v1932_v31 = vpop.f32.mrb[64].mxu1 }
0x14e2   :  { %v1938_v23 = vadd.f32 %v1932_v31, %v1893_v3  ;;  %v2625_v33 = vpop.f32.mrb[65].mxu1 }
0x14e3   :  { %v1935_v4 = vpop.f32.mrb[66].mxu1 }
0x14e4   :  { %2742 = vtanh.f32 %v1938_v23  ;;  %v2626_v35 = vpop.f32.mrb[67].mxu1 }
0x14ee   :  { %v2743_v36 = vpop.eup %2742 }
0x14ef   :  { %1940 = vst.msk [vmem:[#allocation3 + $0x30] sm:$0xff] %vm419_vm3, %v2743_v36  ;;  %v1943_v37 = vpack.c.bf16 %v2743_v36, %v2743_v36 }
0x14f0   :  { %1941 = vst.msk [vmem:[#allocation3 + $0x8] sm:$0xff] %vm428_vm4, %v2743_v36 }
0x14f1   :  { %2636 = vmatmul.mubr.msk.bf16.vlgmr.msra.gmra.mrb[64].mxu0 %vm470_vm5, %v1943_v37 }
0x15c4   :  { %v1981_v40 = vpop.f32.mrb[64].mxu0 }
0x15c5   :  { %v1987_v41 = vadd.f32 %v1981_v40, %v1942_v39  ;;  %v2637_v42 = vpop.f32.mrb[65].mxu0 }
0x15c6   :  { %v1984_v43 = vpop.f32.mrb[66].mxu0 }
0x15c7   :  { %2744 = vtanh.f32 %v1987_v41  ;;  %v2638_v44 = vpop.f32.mrb[67].mxu0 }
0x15d1   :  { %v2745_v45 = vpop.eup %2744 }
0x15d2   :  { %1989 = vst.msk [vmem:[#allocation3 + $0x38] sm:$0xff] %vm419_vm3, %v2745_v45 }
0x15d3   :  { %1990 = vst.msk [vmem:[#allocation3] sm:$0xff] %vm428_vm4, %v2745_v45 }
0x15d9   :  { %v1991_v47 = vld [vmem:[#allocation3 + $0x38] sm:$0xff] }
0x15da   :  { %v1999_v48 = vmul.f32 %v2120_v46, %v1991_v47 }
0x15dc   :  { %v2000_v49 = vsel %vm470_vm5, %v1999_v48, 0.0 }
0x15dd   :  { %2001 = vadd.xlane.f32.xlu0 %v2000_v49 }
0x166a   :  { %v2002_v21 = vpop.xlane.xlu0 %2001 }
0x166b   :  { %v2010_v51 = vadd.f32 %v2121_v50, %v2002_v21 }
0x166d   :  { %2012 = vst.msk [vmem:[%s3382_s10] sm:$0xff] %vm2011_vm6, %v2010_v51 }

</bundles_post_ra>
